<compile_context>
chip_gen: v6e
topology: v6e:2x2x1
jax: 0.10.0
libtpu: 0.0.40
codegen_flags: <defaults>
</compile_context>

<pallas_src>
import jax
import jax.numpy as jnp
from jax.experimental import pallas as pl
from jax.experimental.pallas import tpu as pltpu

IN_FEATURES = 1 * 28 * 28   # 784
HIDDEN = 300
NUM_CLASSES = 10

IN_PAD = 896                # 784 -> 7*128
HID_PAD = 384               # 300 -> 3*128
OUT_PAD = 128               # 10  -> 1*128


def _round_up(x, m):
    return (x + m - 1) // m * m


def mlp_kernel(x_ref,
               w1_ref, b1_ref,
               w2_ref, b2_ref,
               w3_ref, b3_ref,
               w4_ref, b4_ref,
               w5_ref, b5_ref,
               o_ref):
    # Five matmuls + bias + ReLU fused.  Matmul inputs are bf16, accumulation is f32,
    # bias-add + ReLU epilogue stays in f32 (then recast to bf16 for the next matmul).
    h = jnp.dot(x_ref[...], w1_ref[...], preferred_element_type=jnp.float32)
    h = jnp.maximum(h + b1_ref[...], 0.0).astype(jnp.bfloat16)        # fc1 + ReLU
    # dropout1: identity in eval mode

    h = jnp.dot(h, w2_ref[...], preferred_element_type=jnp.float32)
    h = jnp.maximum(h + b2_ref[...], 0.0).astype(jnp.bfloat16)        # fc2 + ReLU
    # dropout2: identity in eval mode

    h = jnp.dot(h, w3_ref[...], preferred_element_type=jnp.float32)
    h = jnp.maximum(h + b3_ref[...], 0.0).astype(jnp.bfloat16)        # fc3 + ReLU
    # dropout3: identity in eval mode

    h = jnp.dot(h, w4_ref[...], preferred_element_type=jnp.float32)
    h = jnp.maximum(h + b4_ref[...], 0.0).astype(jnp.bfloat16)        # fc4 + ReLU
    # dropout4: identity in eval mode

    out = jnp.dot(h, w5_ref[...], preferred_element_type=jnp.float32)
    o_ref[...] = (out + b5_ref[...]).astype(o_ref.dtype)              # fc5 (logits)


def init_params(key):
    """Deterministic synthetic parameters with the shapes from modelD.__init__.

    Stored unpadded as (in_features, out_features) / (out_features,), PyTorch
    default-init scale."""
    dims = [(IN_FEATURES, HIDDEN), (HIDDEN, HIDDEN), (HIDDEN, HIDDEN),
            (HIDDEN, HIDDEN), (HIDDEN, NUM_CLASSES)]
    params = {}
    for i, (fan_in, fan_out) in enumerate(dims, start=1):
        key, kw, kb = jax.random.split(key, 3)
        bound = 1.0 / jnp.sqrt(fan_in)
        params[f"w{i}"] = jax.random.uniform(
            kw, (fan_in, fan_out), jnp.float32, minval=-bound, maxval=bound)
        params[f"b{i}"] = jax.random.uniform(
            kb, (fan_out,), jnp.float32, minval=-bound, maxval=bound)
    return params


def prepare_params(params):
    """Zero-pad to lane-aligned shapes and cast weights to bf16.

    Exact for this ReLU MLP: padded inputs/hidden units are zero and contribute
    nothing; padded logit lanes are zero and sliced off in the wrapper.  Biases
    stay f32 for the f32 epilogue."""
    dims = [(IN_FEATURES, HIDDEN), (HIDDEN, HIDDEN), (HIDDEN, HIDDEN),
            (HIDDEN, HIDDEN), (HIDDEN, NUM_CLASSES)]
    pads = [(IN_PAD, HID_PAD), (HID_PAD, HID_PAD), (HID_PAD, HID_PAD),
            (HID_PAD, HID_PAD), (HID_PAD, OUT_PAD)]
    prepped = {}
    for i, ((fi, fo), (pi, po)) in enumerate(zip(dims, pads), start=1):
        w = params[f"w{i}"]
        b = params[f"b{i}"]
        wp = jnp.zeros((pi, po), jnp.float32).at[:fi, :fo].set(w)
        bp = jnp.zeros((1, po), jnp.float32).at[0, :fo].set(b)
        prepped[f"w{i}"] = wp.astype(jnp.bfloat16)
        prepped[f"b{i}"] = bp
    return prepped


def model_d_forward(x_nchw, prepped):
    """x_nchw: (B, 1, 28, 28) float32.  prepped: output of prepare_params()."""
    B = x_nchw.shape[0]
    x_flat = x_nchw.reshape(B, -1).astype(jnp.float32)      # like x.view(B, -1)

    # Batch tile: >=16 rows (bf16 sublane packing), capped at 512 rows/step.
    TM = min(512, _round_up(max(B, 1), 16))
    B_pad = _round_up(B, TM)

    # Pad batch rows and 784 -> 896 feature lanes with zeros; bf16 for the MXU/DMA.
    x_p = jnp.zeros((B_pad, IN_PAD), jnp.bfloat16)
    x_p = x_p.at[:B, :IN_FEATURES].set(x_flat.astype(jnp.bfloat16))

    grid = (pl.cdiv(B_pad, TM),)
    const_map = lambda i: (0, 0)                 # weights/biases resident across steps

    in_specs = [pl.BlockSpec((TM, IN_PAD), lambda i: (i, 0))]
    args = [x_p]
    for i in range(1, 6):
        w, b = prepped[f"w{i}"], prepped[f"b{i}"]
        in_specs.append(pl.BlockSpec(w.shape, const_map))
        in_specs.append(pl.BlockSpec(b.shape, const_map))
        args.extend([w, b])

    out_padded = pl.pallas_call(
        mlp_kernel,
        out_shape=jax.ShapeDtypeStruct((B_pad, OUT_PAD), jnp.float32),
        grid=grid,
        in_specs=in_specs,
        out_specs=pl.BlockSpec((TM, OUT_PAD), lambda i: (i, 0)),
        compiler_params=pltpu.CompilerParams(
            dimension_semantics=("parallel",),          # megacore split on v7x
            vmem_limit_bytes=48 * 1024 * 1024,          # headroom; actual use ~few MiB
        ),
    )(*args)

    # Drop padded batch rows and padded logit lanes.
    return out_padded[:B, :NUM_CLASSES]


def reference_forward(x_nchw, params):
    """Pure-JAX f32 reference (unpadded params)."""
    h = x_nchw.reshape(x_nchw.shape[0], -1)
    for i in range(1, 5):
        h = jnp.maximum(h @ params[f"w{i}"] + params[f"b{i}"], 0.0)
    return h @ params["w5"] + params["b5"]


if __name__ == "__main__":
    key = jax.random.PRNGKey(0)
    key, kx = jax.random.split(key)
    params = init_params(key)
    prepped = prepare_params(params)

    # Small batch, full MNIST spatial shape implied by fc1 (1*28*28).
    x = jax.random.normal(kx, (2, 1, 28, 28), dtype=jnp.float32)

    out = model_d_forward(x, prepped)
    out = jax.block_until_ready(out)

    ref = reference_forward(x, params)
    assert out.shape == (2, 10)
    # bf16 matmul inputs (f32 accumulation) -> relaxed tolerance vs. the f32 reference.
    max_diff = jnp.max(jnp.abs(out - ref))
    assert jnp.allclose(out, ref, atol=5e-2, rtol=5e-2), (
        f"mismatch vs reference: max abs diff {max_diff}")

    print("KERNEL_OK")
</pallas_src>

<mosaic_0001>
module attributes {stable_mosaic.version = 11 : i64} {
  func.func @mlp_kernel(%arg0: i32, %arg1: memref<16x896xbf16, #tpu.memory_space<vmem>>, %arg2: memref<896x384xbf16, #tpu.memory_space<vmem>>, %arg3: memref<1x384xf32, #tpu.memory_space<vmem>>, %arg4: memref<384x384xbf16, #tpu.memory_space<vmem>>, %arg5: memref<1x384xf32, #tpu.memory_space<vmem>>, %arg6: memref<384x384xbf16, #tpu.memory_space<vmem>>, %arg7: memref<1x384xf32, #tpu.memory_space<vmem>>, %arg8: memref<384x384xbf16, #tpu.memory_space<vmem>>, %arg9: memref<1x384xf32, #tpu.memory_space<vmem>>, %arg10: memref<384x128xbf16, #tpu.memory_space<vmem>>, %arg11: memref<1x128xf32, #tpu.memory_space<vmem>>, %arg12: memref<16x128xf32, #tpu.memory_space<vmem>>) attributes {dimension_semantics = [#tpu.dimension_semantics<parallel>], iteration_bounds = array<i64: 1>, scalar_prefetch = 0 : i64, scratch_operands = 0 : i64, tpu.core_type = #tpu.core_type<tc>, window_params = [{transform_indices = @transform_0, window_bounds = array<i64: 16, 896>}, {pipeline_mode = #tpu.pipeline_mode<synchronous>, transform_indices = @transform_1, window_bounds = array<i64: 896, 384>}, {pipeline_mode = #tpu.pipeline_mode<synchronous>, transform_indices = @transform_2, window_bounds = array<i64: 1, 384>}, {pipeline_mode = #tpu.pipeline_mode<synchronous>, transform_indices = @transform_3, window_bounds = array<i64: 384, 384>}, {pipeline_mode = #tpu.pipeline_mode<synchronous>, transform_indices = @transform_4, window_bounds = array<i64: 1, 384>}, {pipeline_mode = #tpu.pipeline_mode<synchronous>, transform_indices = @transform_5, window_bounds = array<i64: 384, 384>}, {pipeline_mode = #tpu.pipeline_mode<synchronous>, transform_indices = @transform_6, window_bounds = array<i64: 1, 384>}, {pipeline_mode = #tpu.pipeline_mode<synchronous>, transform_indices = @transform_7, window_bounds = array<i64: 384, 384>}, {pipeline_mode = #tpu.pipeline_mode<synchronous>, transform_indices = @transform_8, window_bounds = array<i64: 1, 384>}, {pipeline_mode = #tpu.pipeline_mode<synchronous>, transform_indices = @transform_9, window_bounds = array<i64: 384, 128>}, {pipeline_mode = #tpu.pipeline_mode<synchronous>, transform_indices = @transform_10, window_bounds = array<i64: 1, 128>}, {transform_indices = @transform_11, window_bounds = array<i64: 16, 128>}]} {
    %c0 = arith.constant 0 : index
    %c0_0 = arith.constant 0 : index
    %0 = vector.load %arg1[%c0, %c0_0] : memref<16x896xbf16, #tpu.memory_space<vmem>>, vector<16x896xbf16>
    %c0_1 = arith.constant 0 : index
    %c0_2 = arith.constant 0 : index
    %1 = vector.load %arg2[%c0_1, %c0_2] : memref<896x384xbf16, #tpu.memory_space<vmem>>, vector<896x384xbf16>
    %cst = arith.constant dense<0.000000e+00> : vector<16x384xf32>
    %2 = tpu.matmul %0, %1, %cst {dimension_numbers = #tpu.dot_dimension_numbers<[1], [0], [0], [1], [0, 0, 1, 1], [], []>} : vector<16x896xbf16>, vector<896x384xbf16>, vector<16x384xf32> -> vector<16x384xf32>
    %c0_3 = arith.constant 0 : index
    %c0_4 = arith.constant 0 : index
    %3 = vector.load %arg3[%c0_3, %c0_4] : memref<1x384xf32, #tpu.memory_space<vmem>>, vector<1x384xf32>
    %4 = vector.broadcast %3 : vector<1x384xf32> to vector<16x384xf32>
    %5 = arith.addf %2, %4 : vector<16x384xf32>
    %cst_5 = arith.constant 0.000000e+00 : f32
    %6 = vector.broadcast %cst_5 : f32 to vector<16x384xf32>
    %7 = arith.maximumf %5, %6 : vector<16x384xf32>
    %8 = arith.truncf %7 : vector<16x384xf32> to vector<16x384xbf16>
    %c0_6 = arith.constant 0 : index
    %c0_7 = arith.constant 0 : index
    %9 = vector.load %arg4[%c0_6, %c0_7] : memref<384x384xbf16, #tpu.memory_space<vmem>>, vector<384x384xbf16>
    %cst_8 = arith.constant dense<0.000000e+00> : vector<16x384xf32>
    %10 = tpu.matmul %8, %9, %cst_8 {dimension_numbers = #tpu.dot_dimension_numbers<[1], [0], [0], [1], [0, 0, 1, 1], [], []>} : vector<16x384xbf16>, vector<384x384xbf16>, vector<16x384xf32> -> vector<16x384xf32>
    %c0_9 = arith.constant 0 : index
    %c0_10 = arith.constant 0 : index
    %11 = vector.load %arg5[%c0_9, %c0_10] : memref<1x384xf32, #tpu.memory_space<vmem>>, vector<1x384xf32>
    %12 = vector.broadcast %11 : vector<1x384xf32> to vector<16x384xf32>
    %13 = arith.addf %10, %12 : vector<16x384xf32>
    %cst_11 = arith.constant 0.000000e+00 : f32
    %14 = vector.broadcast %cst_11 : f32 to vector<16x384xf32>
    %15 = arith.maximumf %13, %14 : vector<16x384xf32>
    %16 = arith.truncf %15 : vector<16x384xf32> to vector<16x384xbf16>
    %c0_12 = arith.constant 0 : index
    %c0_13 = arith.constant 0 : index
    %17 = vector.load %arg6[%c0_12, %c0_13] : memref<384x384xbf16, #tpu.memory_space<vmem>>, vector<384x384xbf16>
    %cst_14 = arith.constant dense<0.000000e+00> : vector<16x384xf32>
    %18 = tpu.matmul %16, %17, %cst_14 {dimension_numbers = #tpu.dot_dimension_numbers<[1], [0], [0], [1], [0, 0, 1, 1], [], []>} : vector<16x384xbf16>, vector<384x384xbf16>, vector<16x384xf32> -> vector<16x384xf32>
    %c0_15 = arith.constant 0 : index
    %c0_16 = arith.constant 0 : index
    %19 = vector.load %arg7[%c0_15, %c0_16] : memref<1x384xf32, #tpu.memory_space<vmem>>, vector<1x384xf32>
    %20 = vector.broadcast %19 : vector<1x384xf32> to vector<16x384xf32>
    %21 = arith.addf %18, %20 : vector<16x384xf32>
    %cst_17 = arith.constant 0.000000e+00 : f32
    %22 = vector.broadcast %cst_17 : f32 to vector<16x384xf32>
    %23 = arith.maximumf %21, %22 : vector<16x384xf32>
    %24 = arith.truncf %23 : vector<16x384xf32> to vector<16x384xbf16>
    %c0_18 = arith.constant 0 : index
    %c0_19 = arith.constant 0 : index
    %25 = vector.load %arg8[%c0_18, %c0_19] : memref<384x384xbf16, #tpu.memory_space<vmem>>, vector<384x384xbf16>
    %cst_20 = arith.constant dense<0.000000e+00> : vector<16x384xf32>
    %26 = tpu.matmul %24, %25, %cst_20 {dimension_numbers = #tpu.dot_dimension_numbers<[1], [0], [0], [1], [0, 0, 1, 1], [], []>} : vector<16x384xbf16>, vector<384x384xbf16>, vector<16x384xf32> -> vector<16x384xf32>
    %c0_21 = arith.constant 0 : index
    %c0_22 = arith.constant 0 : index
    %27 = vector.load %arg9[%c0_21, %c0_22] : memref<1x384xf32, #tpu.memory_space<vmem>>, vector<1x384xf32>
    %28 = vector.broadcast %27 : vector<1x384xf32> to vector<16x384xf32>
    %29 = arith.addf %26, %28 : vector<16x384xf32>
    %cst_23 = arith.constant 0.000000e+00 : f32
    %30 = vector.broadcast %cst_23 : f32 to vector<16x384xf32>
    %31 = arith.maximumf %29, %30 : vector<16x384xf32>
    %32 = arith.truncf %31 : vector<16x384xf32> to vector<16x384xbf16>
    %c0_24 = arith.constant 0 : index
    %c0_25 = arith.constant 0 : index
    %33 = vector.load %arg10[%c0_24, %c0_25] : memref<384x128xbf16, #tpu.memory_space<vmem>>, vector<384x128xbf16>
    %cst_26 = arith.constant dense<0.000000e+00> : vector<16x128xf32>
    %34 = tpu.matmul %32, %33, %cst_26 {dimension_numbers = #tpu.dot_dimension_numbers<[1], [0], [0], [1], [0, 0, 1, 1], [], []>} : vector<16x384xbf16>, vector<384x128xbf16>, vector<16x128xf32> -> vector<16x128xf32>
    %c0_27 = arith.constant 0 : index
    %c0_28 = arith.constant 0 : index
    %35 = vector.load %arg11[%c0_27, %c0_28] : memref<1x128xf32, #tpu.memory_space<vmem>>, vector<1x128xf32>
    %36 = vector.broadcast %35 : vector<1x128xf32> to vector<16x128xf32>
    %37 = arith.addf %34, %36 : vector<16x128xf32>
    %c0_29 = arith.constant 0 : index
    %c0_30 = arith.constant 0 : index
    %38 = vector.load %arg12[%c0_29, %c0_30] : memref<16x128xf32, #tpu.memory_space<vmem>>, vector<16x128xf32>
    tpu.vector_store %arg12[%c0_29, %c0_30], %37 {strides = array<i32>} : memref<16x128xf32, #tpu.memory_space<vmem>>, vector<16x128xf32>,
    return
  }
  func.func @transform_0(%arg0: i32) -> (i32, i32) {
    %c0_i32 = arith.constant 0 : i32
    %c0_i32_0 = arith.constant 0 : i32
    return %arg0, %c0_i32 : i32, i32
  }
  func.func @transform_1(%arg0: i32) -> (i32, i32) {
    %c0_i32 = arith.constant 0 : i32
    %c0_i32_0 = arith.constant 0 : i32
    %c0_i32_1 = arith.constant 0 : i32
    return %c0_i32, %c0_i32_0 : i32, i32
  }
  func.func @transform_2(%arg0: i32) -> (i32, i32) {
    %c0_i32 = arith.constant 0 : i32
    %c0_i32_0 = arith.constant 0 : i32
    %c0_i32_1 = arith.constant 0 : i32
    return %c0_i32, %c0_i32_0 : i32, i32
  }
  func.func @transform_3(%arg0: i32) -> (i32, i32) {
    %c0_i32 = arith.constant 0 : i32
    %c0_i32_0 = arith.constant 0 : i32
    %c0_i32_1 = arith.constant 0 : i32
    return %c0_i32, %c0_i32_0 : i32, i32
  }
  func.func @transform_4(%arg0: i32) -> (i32, i32) {
    %c0_i32 = arith.constant 0 : i32
    %c0_i32_0 = arith.constant 0 : i32
    %c0_i32_1 = arith.constant 0 : i32
    return %c0_i32, %c0_i32_0 : i32, i32
  }
  func.func @transform_5(%arg0: i32) -> (i32, i32) {
    %c0_i32 = arith.constant 0 : i32
    %c0_i32_0 = arith.constant 0 : i32
    %c0_i32_1 = arith.constant 0 : i32
    return %c0_i32, %c0_i32_0 : i32, i32
  }
  func.func @transform_6(%arg0: i32) -> (i32, i32) {
    %c0_i32 = arith.constant 0 : i32
    %c0_i32_0 = arith.constant 0 : i32
    %c0_i32_1 = arith.constant 0 : i32
    return %c0_i32, %c0_i32_0 : i32, i32
  }
  func.func @transform_7(%arg0: i32) -> (i32, i32) {
    %c0_i32 = arith.constant 0 : i32
    %c0_i32_0 = arith.constant 0 : i32
    %c0_i32_1 = arith.constant 0 : i32
    return %c0_i32, %c0_i32_0 : i32, i32
  }
  func.func @transform_8(%arg0: i32) -> (i32, i32) {
    %c0_i32 = arith.constant 0 : i32
    %c0_i32_0 = arith.constant 0 : i32
    %c0_i32_1 = arith.constant 0 : i32
    return %c0_i32, %c0_i32_0 : i32, i32
  }
  func.func @transform_9(%arg0: i32) -> (i32, i32) {
    %c0_i32 = arith.constant 0 : i32
    %c0_i32_0 = arith.constant 0 : i32
    %c0_i32_1 = arith.constant 0 : i32
    return %c0_i32, %c0_i32_0 : i32, i32
  }
  func.func @transform_10(%arg0: i32) -> (i32, i32) {
    %c0_i32 = arith.constant 0 : i32
    %c0_i32_0 = arith.constant 0 : i32
    %c0_i32_1 = arith.constant 0 : i32
    return %c0_i32, %c0_i32_0 : i32, i32
  }
  func.func @transform_11(%arg0: i32) -> (i32, i32) {
    %c0_i32 = arith.constant 0 : i32
    %c0_i32_0 = arith.constant 0 : i32
    return %arg0, %c0_i32 : i32, i32
  }
}

</mosaic_0001>

<bundles_post_ra>
// kernel: tpu_custom_call.1
= control target key start
LH: loop header
LB: loop body
LE: loop exit
PB: predicated region body
PF: predicated region fallthrough
CT: control target
= control target key end

     0   :  { %16 = vsyncpa [#allocation3], 0  ;;  %s5654_s0 = inlined_call_operand.hbm [shape: bf16[16,896], index: 0, kind: input, shape index: {}]   ;;  %s5655_s1 = inlined_call_operand.hbm [shape: bf16[896,384], index: 1, kind: input, shape index: {}]   ;;  %s5656_s2 = inlined_call_operand.vmem [shape: f32[1,384], index: 2, kind: input, shape index: {}]   ;;  %s5657_s3 = inlined_call_operand.hbm [shape: bf16[384,384], index: 3, kind: input, shape index: {}]   ;;  %s5658_s4 = inlined_call_operand.vmem [shape: f32[1,384], index: 4, kind: input, shape index: {}]   ;;  %s5659_s5 = inlined_call_operand.hbm [shape: bf16[384,384], index: 5, kind: input, shape index: {}]   ;;  %s5660_s6 = inlined_call_operand.vmem [shape: f32[1,384], index: 6, kind: input, shape index: {}]   ;;  %s5661_s7 = inlined_call_operand.hbm [shape: bf16[384,384], index: 7, kind: input, shape index: {}]   ;;  %s5662_s8 = inlined_call_operand.vmem [shape: f32[1,384], index: 8, kind: input, shape index: {}]   ;;  %s5663_s9 = inlined_call_operand.hbm [shape: bf16[384,128], index: 9, kind: input, shape index: {}]   ;;  %s5664_s10 = inlined_call_operand.vmem [shape: f32[1,128], index: 10, kind: input, shape index: {}]   ;;  %s5665_s11 = inlined_call_operand.hbm [shape: f32[16,128], index: 11, kind: output, shape index: {}]  }
   0x1   :  { %17 = vsyncpa [#allocation6], 0 }
   0x2   :  { %18 = vsyncpa [#allocation9], 0 }
   0x3   :  { %19 = vsyncpa [#allocation12], 0 }
   0x4   :  { %20 = vsyncpa [#allocation4], 0  ;;  %s5402_s17 = smov [#allocation5]  }
   0x5   :  { %s38_s18 = sshll.u32 %s5402_s17, 4  ;;  %s39_s18 = int_to_ptr.vmem [resolvable:$true] %s38_s18 }
   0x6   :  { %s5260_s19 = scalar_lea.vmem %s39_s18, 21504  ;;  %p5265_p1 = scmp.lt.s32.totalorder %s39_s18, %s39_s18 }
   0x7   :  { %p5261_p0 = scmp.ne.s32.totalorder %s39_s18, %s5260_s19  ;;  %p5266_p2 = scmp.lt.s32.totalorder %s5260_s19, %s5260_s19 }
   0x9   :  { %p5267_p3 = por %p5266_p2, %p5265_p1 }
   0xb   :  { %p5268_p4 = pnand %p5267_p3, %p5261_p0 }
   0xd   :  { %5271 = shalt.err (!%p5268_p4)
}
   0xe   :  { %s5403_s20 = smov 192   ;;  %s5404_s21 = smov 12  }
   0xf   :  { %44 = dma.hbm_to_vmem [thread:$0]  %s5655_s1, 21504, %s39_s18, [#allocation6], %s5403_s20, %s5403_s20, %s5404_s21  }
  0x10   :  { %s5405_s24 = smov [#allocation8]   ;;  %s5406_s26 = smov [#allocation2]  }
  0x11   :  { %s66_s25 = sshll.u32 %s5405_s24, 4  ;;  %s26_s27 = sshll.u32 %s5406_s26, 4  ;;  %s67_s25 = int_to_ptr.vmem [resolvable:$true] %s66_s25  ;;  %s27_s27 = int_to_ptr.vmem [resolvable:$true] %s26_s27 }
  0x12   :  { %s5280_s28 = scalar_lea.vmem %s67_s25, 9216  ;;  %p5285_p6 = scmp.lt.s32.totalorder %s67_s25, %s67_s25 }
  0x13   :  { %p5281_p5 = scmp.ne.s32.totalorder %s67_s25, %s5280_s28  ;;  %p5286_p7 = scmp.lt.s32.totalorder %s5280_s28, %s5280_s28 }
  0x15   :  { %p5287_p8 = por %p5286_p7, %p5285_p6 }
  0x17   :  { %p5288_p9 = pnand %p5287_p8, %p5281_p5 }
  0x19   :  { %5291 = shalt.err (!%p5288_p9)
}
  0x1a   :  { %72 = dma.hbm_to_vmem [thread:$0]  %s5659_s5, 9216, %s67_s25, [#allocation9], %s5403_s20, %s5403_s20, %s5404_s21  }
  0x1b   :  { %s5300_s1 = scalar_lea.vmem %s27_s27, 896  ;;  %p5305_p11 = scmp.lt.s32.totalorder %s27_s27, %s27_s27 }
  0x1c   :  { %p5301_p10 = scmp.ne.s32.totalorder %s27_s27, %s5300_s1  ;;  %p5306_p12 = scmp.lt.s32.totalorder %s5300_s1, %s5300_s1 }
  0x1e   :  { %p5307_p13 = por %p5306_p12, %p5305_p11 }
  0x20   :  { %p5308_p0 = pnand %p5307_p13, %p5301_p10 }
  0x22   :  { %5311 = shalt.err (!%p5308_p0)
}
  0x23   :  { %s5407_s12 = smov 448   ;;  %s5408_s13 = smov 28  }
  0x24   :  { %32 = dma.hbm_to_vmem [thread:$0]  %s5654_s0, 896, %s27_s27, [#allocation3], %s5407_s12, %s5407_s12, %s5408_s13  }
  0x25   :  { %s5409_s16 = smov [#allocation7]   ;;  %s5410_s18 = smov [#allocation10]  }
  0x26   :  { %s52_s17 = sshll.u32 %s5409_s16, 4  ;;  %s80_s19 = sshll.u32 %s5410_s18, 4  ;;  %s53_s17 = int_to_ptr.vmem [resolvable:$true] %s52_s17  ;;  %s81_s19 = int_to_ptr.vmem [resolvable:$true] %s80_s19 }
  0x27   :  { %s5320_s5 = scalar_lea.vmem %s53_s17, 9216  ;;  %p5325_p2 = scmp.lt.s32.totalorder %s53_s17, %s53_s17 }
  0x28   :  { %p5321_p1 = scmp.ne.s32.totalorder %s53_s17, %s5320_s5  ;;  %p5326_p3 = scmp.lt.s32.totalorder %s5320_s5, %s5320_s5 }
  0x2a   :  { %p5327_p4 = por %p5326_p3, %p5325_p2 }
  0x2c   :  { %p5328_p5 = pnand %p5327_p4, %p5321_p1 }
  0x2e   :  { %5331 = shalt.err (!%p5328_p5)
}
  0x2f   :  { %58 = dma.hbm_to_vmem [thread:$0]  %s5657_s3, 9216, %s53_s17, [#allocation6], %s5403_s20, %s5403_s20, %s5404_s21  }
  0x30   :  { %s5340_s0 = scalar_lea.vmem %s81_s19, 9216  ;;  %p5345_p7 = scmp.lt.s32.totalorder %s81_s19, %s81_s19 }
  0x31   :  { %p5341_p6 = scmp.ne.s32.totalorder %s81_s19, %s5340_s0  ;;  %p5346_p8 = scmp.lt.s32.totalorder %s5340_s0, %s5340_s0 }
  0x33   :  { %p5347_p9 = por %p5346_p8, %p5345_p7 }
  0x35   :  { %p5348_p10 = pnand %p5347_p9, %p5341_p6 }
  0x37   :  { %5351 = shalt.err (!%p5348_p10)
}
  0x38   :  { %86 = dma.hbm_to_vmem [thread:$0]  %s5661_s7, 9216, %s81_s19, [#allocation9], %s5403_s20, %s5403_s20, %s5404_s21  }
  0x39   :  { %s5411_s26 = smov [#allocation11]  }
  0x3a   :  { %s94_s27 = sshll.u32 %s5411_s26, 4  ;;  %s95_s27 = int_to_ptr.vmem [resolvable:$true] %s94_s27 }
  0x3b   :  { %s5360_s28 = scalar_lea.vmem %s95_s27, 3072  ;;  %p5365_p12 = scmp.lt.s32.totalorder %s95_s27, %s95_s27 }
  0x3c   :  { %p5361_p11 = scmp.ne.s32.totalorder %s95_s27, %s5360_s28  ;;  %p5366_p13 = scmp.lt.s32.totalorder %s5360_s28, %s5360_s28 }
  0x3e   :  { %p5367_p0 = por %p5366_p13, %p5365_p12 }
  0x40   :  { %p5368_p1 = pnand %p5367_p0, %p5361_p11 }
  0x42   :  { %5371 = shalt.err (!%p5368_p1)
}
  0x43   :  { %s5412_s3 = smov 64   ;;  %s5413_s29 = smov 4  }
  0x44   :  { %100 = dma.hbm_to_vmem [thread:$0]  %s5663_s9, 3072, %s95_s27, [#allocation12], %s5412_s3, %s5412_s3, %s5413_s29  }
  0x45   :  { %5392 = dma.done.wait [#allocation3], 896  }
  0x46   :  { %5393 = vsyncadd [#allocation3], 4294966400 }
  0x47   :  { %5394 = dma.done.wait [#allocation6], 30720  }
  0x48   :  { %5395 = vsyncadd [#allocation6], 4294936576 }
  0x49   :  { %5396 = dma.done.wait [#allocation9], 18432  }
  0x4a   :  { %5397 = vsyncadd [#allocation9], 4294948864 }
  0x4b   :  { %5398 = dma.done.wait [#allocation12], 3072  }
  0x4c   :  { %5399 = vsyncadd [#allocation12], 4294964224  ;;  %v4706_v0 = vld [vmem:[#allocation5 + $0xac] ss:$12 sps:$4 sm:$0xff]   ;;  %v4708_v1 = vld [vmem:[#allocation5 + $0xa8] ss:$12 sps:$4 sm:$0xff]  }
  0x4d   :  { %1303 = vmatprep.subr.bf16.mxu0 %v4706_v0  ;;  %v4709_v2 = vld [vmem:[#allocation5 + $0x22c] ss:$12 sps:$4 sm:$0xff]   ;;  %v4711_v3 = vld [vmem:[#allocation5 + $0x228] ss:$12 sps:$4 sm:$0xff]   ;;  %v4714_v5 = vld [vmem:[#allocation5 + $0x90] ss:$12 sps:$4 sm:$0xff]  }
  0x4e   :  { %1304 = vmatpush1.bf16.msra.mxu0 %v4708_v1  ;;  %v4712_v4 = vld [vmem:[#allocation5 + $0x94] ss:$12 sps:$4 sm:$0xff]   ;;  %1346 = vmatprep.subr.bf16.mxu1 %v4709_v2  ;;  %v4717_v7 = vld [vmem:[#allocation5 + $0x210] ss:$12 sps:$4 sm:$0xff]   ;;  %v4720_v9 = vld [vmem:[#allocation5 + $0x78] ss:$12 sps:$4 sm:$0xff]  }
  0x4f   :  { %v4715_v6 = vld [vmem:[#allocation5 + $0x214] ss:$12 sps:$4 sm:$0xff]   ;;  %1347 = vmatpush1.bf16.msra.mxu1 %v4711_v3  ;;  %1305 = vmatprep.subr.bf16.mxu0 %v4712_v4  ;;  %v4718_v8 = vld [vmem:[#allocation5 + $0x7c] ss:$12 sps:$4 sm:$0xff]   ;;  %v4724_v11 = vld [vmem:[#allocation5 + $0x64] ss:$12 sps:$4 sm:$0xff]  }
  0x50   :  { %1348 = vmatprep.subr.bf16.mxu1 %v4715_v6  ;;  %v4721_v10 = vld [vmem:[#allocation5 + $0x1fc] ss:$12 sps:$4 sm:$0xff]   ;;  %v4723_v12 = vld [vmem:[#allocation5 + $0x1f8] ss:$12 sps:$4 sm:$0xff]   ;;  %v4726_v14 = vld [vmem:[#allocation5 + $0x60] ss:$12 sps:$4 sm:$0xff]  }
  0x51   :  { %v4727_v13 = vld [vmem:[#allocation5 + $0x1e4] ss:$12 sps:$4 sm:$0xff]   ;;  %v4730_v15 = vld [vmem:[#allocation5 + $0x4c] ss:$12 sps:$4 sm:$0xff]   ;;  %v4732_v18 = vld [vmem:[#allocation5 + $0x48] ss:$12 sps:$4 sm:$0xff]  }
  0x52   :  { %1306 = vmatpush1.bf16.msra.mxu0 %v4714_v5  ;;  %v4729_v16 = vld [vmem:[#allocation5 + $0x1e0] ss:$12 sps:$4 sm:$0xff]   ;;  %v4735_v20 = vld [vmem:[#allocation5 + $0x1c8] ss:$12 sps:$4 sm:$0xff]   ;;  %v4738_v22 = vld [vmem:[#allocation5 + $0x30] ss:$12 sps:$4 sm:$0xff]  }
  0x53   :  { %1307 = vmatprep.subr.bf16.mxu0 %v4718_v8  ;;  %1349 = vmatpush1.bf16.msra.mxu1 %v4717_v7  ;;  %v4733_v17 = vld [vmem:[#allocation5 + $0x1cc] ss:$12 sps:$4 sm:$0xff]   ;;  %v4736_v19 = vld [vmem:[#allocation5 + $0x34] ss:$12 sps:$4 sm:$0xff]   ;;  %v4742_v23 = vld [vmem:[#allocation5 + $0x1c] ss:$12 sps:$4 sm:$0xff]  }
  0x54   :  { %1350 = vmatprep.subr.bf16.mxu1 %v4721_v10  ;;  %v4739_v21 = vld [vmem:[#allocation5 + $0x1b4] ss:$12 sps:$4 sm:$0xff]   ;;  %v4741_v24 = vld [vmem:[#allocation5 + $0x1b0] ss:$12 sps:$4 sm:$0xff]   ;;  %v4744_v26 = vld [vmem:[#allocation5 + $0x18] ss:$12 sps:$4 sm:$0xff]  }
  0x55   :  { %v4745_v25 = vld [vmem:[#allocation5 + $0x19c] ss:$12 sps:$4 sm:$0xff]   ;;  %v4748_v27 = vld [vmem:[#allocation5 + $0x4] ss:$12 sps:$4 sm:$0xff]   ;;  %v4750_v30 = vld [vmem:[#allocation5] ss:$12 sps:$4 sm:$0xff]  }
  0x56   :  { %1308 = vmatpush1.bf16.msra.mxu0 %v4720_v9  ;;  %v4747_v28 = vld [vmem:[#allocation5 + $0x198] ss:$12 sps:$4 sm:$0xff]   ;;  %v4753_v32 = vld [vmem:[#allocation5 + $0x180] ss:$12 sps:$4 sm:$0xff]   ;;  %v4756_v34 = vld [vmem:[#allocation5 + $0x168] ss:$12 sps:$4 sm:$0xff]  }
  0x57   :  { %1309 = vmatprep.subr.bf16.mxu0 %v4724_v11  ;;  %1351 = vmatpush1.bf16.msra.mxu1 %v4723_v12  ;;  %v4751_v29 = vld [vmem:[#allocation5 + $0x184] ss:$12 sps:$4 sm:$0xff]   ;;  %v4754_v31 = vld [vmem:[#allocation5 + $0x16c] ss:$12 sps:$4 sm:$0xff]   ;;  %v4760_v35 = vld [vmem:[#allocation5 + $0x154] ss:$12 sps:$4 sm:$0xff]  }
  0x58   :  { %1352 = vmatprep.subr.bf16.mxu1 %v4727_v13  ;;  %v4757_v33 = vld [vmem:[#allocation5 + $0x2ec] ss:$12 sps:$4 sm:$0xff]   ;;  %v4759_v36 = vld [vmem:[#allocation5 + $0x2e8] ss:$12 sps:$4 sm:$0xff]   ;;  %v4762_v38 = vld [vmem:[#allocation5 + $0x150] ss:$12 sps:$4 sm:$0xff]  }
  0x59   :  { %v4763_v37 = vld [vmem:[#allocation5 + $0x2d4] ss:$12 sps:$4 sm:$0xff]   ;;  %v4766_v39 = vld [vmem:[#allocation5 + $0x13c] ss:$12 sps:$4 sm:$0xff]   ;;  %v4768_v42 = vld [vmem:[#allocation5 + $0x138] ss:$12 sps:$4 sm:$0xff]  }
  0x5a   :  { %1310 = vmatpush1.bf16.msra.mxu0 %v4726_v14  ;;  %v4765_v40 = vld [vmem:[#allocation5 + $0x2d0] ss:$12 sps:$4 sm:$0xff]   ;;  %v4771_v44 = vld [vmem:[#allocation5 + $0x2b8] ss:$12 sps:$4 sm:$0xff]   ;;  %v4774_v46 = vld [vmem:[#allocation5 + $0x120] ss:$12 sps:$4 sm:$0xff]  }
  0x5b   :  { %1311 = vmatprep.subr.bf16.mxu0 %v4730_v15  ;;  %1353 = vmatpush1.bf16.msra.mxu1 %v4729_v16  ;;  %v4769_v41 = vld [vmem:[#allocation5 + $0x2bc] ss:$12 sps:$4 sm:$0xff]   ;;  %v4772_v43 = vld [vmem:[#allocation5 + $0x124] ss:$12 sps:$4 sm:$0xff]   ;;  %v4778_v48 = vld [vmem:[#allocation5 + $0x10c] ss:$12 sps:$4 sm:$0xff]  }
  0x5c   :  { %1354 = vmatprep.subr.bf16.mxu1 %v4733_v17  ;;  %v4775_v45 = vld [vmem:[#allocation5 + $0x2a4] ss:$12 sps:$4 sm:$0xff]   ;;  %v5510_v47 = vld [vmem:[#allocation2 + $0x4] ss:$28 sps:$4 sm:$0xff]   ;;  %v4784_v53 = vld [vmem:[#allocation5 + $0xf4] ss:$12 sps:$4 sm:$0xff]  }
  0x5d   :  { %v4777_v49 = vld [vmem:[#allocation5 + $0x2a0] ss:$12 sps:$4 sm:$0xff]   ;;  %1335 = vmatprep.mubr.bf16.mxu0 %v5510_v47  ;;  %v5513_v51 = vld [vmem:[#allocation2 + $0xc] ss:$28 sps:$4 sm:$0xff]   ;;  %v4790_v57 = vld [vmem:[#allocation5 + $0xdc] ss:$12 sps:$4 sm:$0xff]  }
  0x5e   :  { %1312 = vmatpush1.bf16.msra.mxu0 %v4732_v18  ;;  %v4781_v50 = vld [vmem:[#allocation5 + $0x28c] ss:$12 sps:$4 sm:$0xff]   ;;  %v4780_v52 = vld [vmem:[#allocation5 + $0x108] ss:$12 sps:$4 sm:$0xff]   ;;  %1378 = vmatprep.mubr.bf16.mxu1 %v5513_v51  ;;  %v4786_v56 = vld [vmem:[#allocation5 + $0xf0] ss:$12 sps:$4 sm:$0xff]  }
  0x5f   :  { %1313 = vmatprep.subr.bf16.mxu0 %v4736_v19  ;;  %1355 = vmatpush1.bf16.msra.mxu1 %v4735_v20  ;;  %v4783_v54 = vld [vmem:[#allocation5 + $0x288] ss:$12 sps:$4 sm:$0xff]   ;;  %v4789_v58 = vld [vmem:[#allocation5 + $0x270] ss:$12 sps:$4 sm:$0xff]   ;;  %v4792_v60 = vld [vmem:[#allocation5 + $0xd8] ss:$12 sps:$4 sm:$0xff]  }
  0x60   :  { %1356 = vmatprep.subr.bf16.mxu1 %v4739_v21  ;;  %v4787_v55 = vld [vmem:[#allocation5 + $0x274] ss:$12 sps:$4 sm:$0xff]   ;;  %v4793_v59 = vld [vmem:[#allocation5 + $0x25c] ss:$12 sps:$4 sm:$0xff]   ;;  %v4796_v61 = vld [vmem:[#allocation5 + $0xc4] ss:$12 sps:$4 sm:$0xff]  }
  0x61   :  { %v4795_v62 = vld [vmem:[#allocation5 + $0x258] ss:$12 sps:$4 sm:$0xff]   ;;  %v4798_v0 = vld [vmem:[#allocation5 + $0xc0] ss:$12 sps:$4 sm:$0xff]   ;;  %v4805_v5 = vld [vmem:[#allocation5 + $0x3a8] ss:$12 sps:$4 sm:$0xff]  }
  0x62   :  { %1314 = vmatpush1.bf16.msra.mxu0 %v4738_v22  ;;  %v4799_v63 = vld [vmem:[#allocation5 + $0x244] ss:$12 sps:$4 sm:$0xff]   ;;  %v4807_v1 = vld [vmem:[#allocation5 + $0x3ac] ss:$12 sps:$4 sm:$0xff]   ;;  %v4816_v7 = vld [vmem:[#allocation5 + $0x394] ss:$12 sps:$4 sm:$0xff]  }
  0x63   :  { %1315 = vmatprep.subr.bf16.mxu0 %v4742_v23  ;;  %1357 = vmatpush1.bf16.msra.mxu1 %v4741_v24  ;;  %v4804_v2 = vld [vmem:[#allocation5 + $0x240] ss:$12 sps:$4 sm:$0xff]   ;;  %v5516_v3 = vld [vmem:[#allocation2] ss:$28 sps:$4 sm:$0xff]   ;;  %v4814_v10 = vld [vmem:[#allocation5 + $0x390] ss:$12 sps:$4 sm:$0xff]  }
  0x64   :  { %1358 = vmatprep.subr.bf16.mxu1 %v4745_v25  ;;  %v4813_v4 = vld [vmem:[#allocation5 + $0x52c] ss:$12 sps:$4 sm:$0xff]   ;;  %v4811_v8 = vld [vmem:[#allocation5 + $0x528] ss:$12 sps:$4 sm:$0xff]   ;;  %v4817_v12 = vld [vmem:[#allocation5 + $0x510] ss:$12 sps:$4 sm:$0xff]  }
  0x65   :  { %v5518_v6 = vld [vmem:[#allocation2 + $0x8] ss:$28 sps:$4 sm:$0xff]   ;;  %v4819_v9 = vld [vmem:[#allocation5 + $0x514] ss:$12 sps:$4 sm:$0xff]   ;;  %v4822_v11 = vld [vmem:[#allocation5 + $0x37c] ss:$12 sps:$4 sm:$0xff]  }
  0x66   :  { %1316 = vmatpush1.bf16.msra.mxu0 %v4744_v26  ;;  %v5414_v13 = vmov 0   ;;  %v4825_v14 = vld [vmem:[#allocation5 + $0x4fc] ss:$12 sps:$4 sm:$0xff]   ;;  %v4820_v15 = vld [vmem:[#allocation5 + $0x378] ss:$12 sps:$4 sm:$0xff]   ;;  %vm5416_vm0 = vmmov 0  }
  0x67   :  { %1317 = vmatprep.subr.bf16.mxu0 %v4748_v27  ;;  %1359 = vmatpush1.bf16.msra.mxu1 %v4747_v28  ;;  %v4828_v16 = vld [vmem:[#allocation5 + $0x364] ss:$12 sps:$4 sm:$0xff]   ;;  %v4826_v19 = vld [vmem:[#allocation5 + $0x360] ss:$12 sps:$4 sm:$0xff]   ;;  %v4832_v23 = vld [vmem:[#allocation5 + $0x348] ss:$12 sps:$4 sm:$0xff]  }
  0x68   :  { %1360 = vmatprep.subr.bf16.mxu1 %v4751_v29  ;;  %v4823_v17 = vld [vmem:[#allocation5 + $0x4f8] ss:$12 sps:$4 sm:$0xff]   ;;  %v4829_v21 = vld [vmem:[#allocation5 + $0x4e0] ss:$12 sps:$4 sm:$0xff]   ;;  %v4835_v25 = vld [vmem:[#allocation5 + $0x4c8] ss:$12 sps:$4 sm:$0xff]  }
  0x69   :  { %v4831_v18 = vld [vmem:[#allocation5 + $0x4e4] ss:$12 sps:$4 sm:$0xff]   ;;  %v4834_v20 = vld [vmem:[#allocation5 + $0x34c] ss:$12 sps:$4 sm:$0xff]   ;;  %v4840_v24 = vld [vmem:[#allocation5 + $0x334] ss:$12 sps:$4 sm:$0xff]  }
  0x6a   :  { %1318 = vmatpush1.bf16.msra.mxu0 %v4750_v30  ;;  %v4837_v22 = vld [vmem:[#allocation5 + $0x4cc] ss:$12 sps:$4 sm:$0xff]   ;;  %v4843_v26 = vld [vmem:[#allocation5 + $0x4b4] ss:$12 sps:$4 sm:$0xff]   ;;  %v4838_v27 = vld [vmem:[#allocation5 + $0x330] ss:$12 sps:$4 sm:$0xff]  }
  0x6b   :  { %1319 = vmatprep.subr.bf16.mxu0 %v4754_v31  ;;  %1361 = vmatpush1.bf16.msra.mxu1 %v4753_v32  ;;  %v4846_v28 = vld [vmem:[#allocation5 + $0x31c] ss:$12 sps:$4 sm:$0xff]   ;;  %v4844_v31 = vld [vmem:[#allocation5 + $0x318] ss:$12 sps:$4 sm:$0xff]   ;;  %s5417_s14 = smov [#allocation13]  }
  0x6c   :  { %1362 = vmatprep.subr.bf16.mxu1 %v4757_v33  ;;  %v4841_v29 = vld [vmem:[#allocation5 + $0x4b0] ss:$12 sps:$4 sm:$0xff]   ;;  %v4847_v32 = vld [vmem:[#allocation5 + $0x498] ss:$12 sps:$4 sm:$0xff]   ;;  %s3958_s15 = sshll.u32 %s5417_s14, 4  ;;  %s3959_s15 = int_to_ptr.vmem [resolvable:$true] %s3958_s15 }
  0x6d   :  { %v4849_v30 = vld [vmem:[#allocation5 + $0x49c] ss:$12 sps:$4 sm:$0xff]   ;;  %v4852_v33 = vld [vmem:[#allocation5 + $0x304] ss:$12 sps:$4 sm:$0xff]   ;;  %s5372_s16 = scalar_lea.vmem %s3959_s15, 256  ;;  %p5377_p3 = scmp.lt.s32.totalorder %s3959_s15, %s3959_s15 }
  0x6e   :  { %1320 = vmatpush2.bf16.msra.mxu0 %v4756_v34  ;;  %v4850_v34 = vld [vmem:[#allocation5 + $0x300] ss:$12 sps:$4 sm:$0xff]   ;;  %p5373_p2 = scmp.ne.s32.totalorder %s3959_s15, %s5372_s16  ;;  %p5378_p4 = scmp.lt.s32.totalorder %s5372_s16, %s5372_s16 }
  0x6f   :  { %1321 = vmatprep.subr.bf16.mxu0 %v4760_v35  ;;  %1363 = vmatpush2.bf16.msra.mxu1 %v4759_v36  ;;  %v4855_v35 = vld [vmem:[#allocation5 + $0x484] ss:$12 sps:$4 sm:$0xff]   ;;  %v4853_v36 = vld [vmem:[#allocation5 + $0x480] ss:$12 sps:$4 sm:$0xff]  }
  0x70   :  { %1364 = vmatprep.subr.bf16.mxu1 %v4763_v37  ;;  %v4858_v37 = vld [vmem:[#allocation5 + $0x46c] ss:$12 sps:$4 sm:$0xff]   ;;  %p5379_p5 = por %p5378_p4, %p5377_p3 }
  0x72   :  { %1322 = vmatpush2.bf16.msra.mxu0 %v4762_v38  ;;  %v4856_v38 = vld [vmem:[#allocation5 + $0x468] ss:$12 sps:$4 sm:$0xff]   ;;  %p5380_p6 = pnand %p5379_p5, %p5373_p2 }
  0x73   :  { %1323 = vmatprep.subr.bf16.mxu0 %v4766_v39  ;;  %1365 = vmatpush2.bf16.msra.mxu1 %v4765_v40  ;;  %v4859_v39 = vld [vmem:[#allocation5 + $0x170] ss:$12 sps:$4 sm:$0xff]  }
  0x74   :  { %1366 = vmatprep.subr.bf16.mxu1 %v4769_v41  ;;  %v5523_v40 = vld [vmem:[#allocation2 + $0x18] ss:$28 sps:$4 sm:$0xff]  }
  0x75   :  { %v5525_v41 = vld [vmem:[#allocation2 + $0x14] ss:$28 sps:$4 sm:$0xff]  }
  0x76   :  { %1324 = vmatpush2.bf16.msra.mxu0 %v4768_v42  ;;  %v4861_v42 = vld [vmem:[#allocation5 + $0xb0] ss:$12 sps:$4 sm:$0xff]  }
  0x77   :  { %1325 = vmatprep.subr.bf16.mxu0 %v4772_v43  ;;  %1367 = vmatpush2.bf16.msra.mxu1 %v4771_v44  ;;  %v4864_v43 = vld [vmem:[#allocation5 + $0x454] ss:$12 sps:$4 sm:$0xff]   ;;  %v4862_v44 = vld [vmem:[#allocation5 + $0x450] ss:$12 sps:$4 sm:$0xff]  }
  0x78   :  { %1368 = vmatprep.subr.bf16.mxu1 %v4775_v45  ;;  %v4865_v45 = vld [vmem:[#allocation5 + $0x158] ss:$12 sps:$4 sm:$0xff]  }
  0x7a   :  { %1326 = vmatpush2.bf16.msra.mxu0 %v4774_v46  ;;  %v4866_v46 = vld [vmem:[#allocation5 + $0x98] ss:$12 sps:$4 sm:$0xff]  }
  0x7b   :  { %1327 = vmatprep.subr.bf16.mxu0 %v4778_v48  ;;  %1369 = vmatpush2.bf16.msra.mxu1 %v4777_v49  ;;  %v4869_v48 = vld [vmem:[#allocation5 + $0x43c] ss:$12 sps:$4 sm:$0xff]   ;;  %v4867_v49 = vld [vmem:[#allocation5 + $0x438] ss:$12 sps:$4 sm:$0xff]  }
  0x7c   :  { %1370 = vmatprep.subr.bf16.mxu1 %v4781_v50  ;;  %v4870_v50 = vld [vmem:[#allocation5 + $0x140] ss:$12 sps:$4 sm:$0xff]  }
  0x7e   :  { %1328 = vmatpush2.bf16.msra.mxu0 %v4780_v52  ;;  %v4871_v52 = vld [vmem:[#allocation5 + $0x80] ss:$12 sps:$4 sm:$0xff]  }
  0x7f   :  { %1329 = vmatprep.subr.bf16.mxu0 %v4784_v53  ;;  %1371 = vmatpush2.bf16.msra.mxu1 %v4783_v54  ;;  %v4874_v53 = vld [vmem:[#allocation5 + $0x424] ss:$12 sps:$4 sm:$0xff]   ;;  %v4872_v54 = vld [vmem:[#allocation5 + $0x420] ss:$12 sps:$4 sm:$0xff]  }
  0x80   :  { %1372 = vmatprep.subr.bf16.mxu1 %v4787_v55  ;;  %v4875_v55 = vld [vmem:[#allocation5 + $0x128] ss:$12 sps:$4 sm:$0xff]  }
  0x82   :  { %1330 = vmatpush2.bf16.msra.mxu0 %v4786_v56  ;;  %v4876_v56 = vld [vmem:[#allocation5 + $0x68] ss:$12 sps:$4 sm:$0xff]  }
  0x83   :  { %1331 = vmatprep.subr.bf16.mxu0 %v4790_v57  ;;  %1373 = vmatpush2.bf16.msra.mxu1 %v4789_v58  ;;  %v4879_v57 = vld [vmem:[#allocation5 + $0x40c] ss:$12 sps:$4 sm:$0xff]   ;;  %v4877_v58 = vld [vmem:[#allocation5 + $0x408] ss:$12 sps:$4 sm:$0xff]  }
  0x84   :  { %1374 = vmatprep.subr.bf16.mxu1 %v4793_v59  ;;  %v4880_v59 = vld [vmem:[#allocation5 + $0x110] ss:$12 sps:$4 sm:$0xff]  }
  0x86   :  { %1332 = vmatpush2.bf16.msra.mxu0 %v4792_v60  ;;  %v4884_v60 = vld [vmem:[#allocation5 + $0x3f4] ss:$12 sps:$4 sm:$0xff]  }
  0x87   :  { %1333 = vmatprep.subr.bf16.mxu0 %v4796_v61  ;;  %1375 = vmatpush2.bf16.msra.mxu1 %v4795_v62  ;;  %v4882_v61 = vld [vmem:[#allocation5 + $0x3f0] ss:$12 sps:$4 sm:$0xff]   ;;  %v4885_v62 = vld [vmem:[#allocation5 + $0xf8] ss:$12 sps:$4 sm:$0xff]  }
  0x88   :  { %1376 = vmatprep.subr.bf16.mxu1 %v4799_v63  ;;  %v4886_v63 = vld [vmem:[#allocation5 + $0x38] ss:$12 sps:$4 sm:$0xff]  }
  0x8a   :  { %1334 = vmatpush2.bf16.msra.mxu0 %v4798_v0  ;;  %v4889_v0 = vld [vmem:[#allocation5 + $0x3dc] ss:$12 sps:$4 sm:$0xff]  }
  0x8b   :  { %1389 = vmatprep.subr.bf16.mxu0 %v4807_v1  ;;  %1377 = vmatpush2.bf16.msra.mxu1 %v4804_v2  ;;  %v4887_v1 = vld [vmem:[#allocation5 + $0x3d8] ss:$12 sps:$4 sm:$0xff]   ;;  %v4890_v2 = vld [vmem:[#allocation5 + $0xe0] ss:$12 sps:$4 sm:$0xff]  }
  0x8c   :  { %1432 = vmatprep.subr.bf16.mxu1 %v4813_v4  ;;  %v4891_v4 = vld [vmem:[#allocation5 + $0x20] ss:$12 sps:$4 sm:$0xff]  }
  0x8d   :  { %1336 = vmatmul.mubr.bf16.vlgmr.msra.gmra.mxu0 %v5516_v3 }
  0x8e   :  { %1390 = vmatpush1.bf16.msra.mxu0 %v4805_v5  ;;  %1379 = vmatmul.mubr.bf16.vlgmr.msra.gmra.mxu1 %v5518_v6  ;;  %v4894_v5 = vld [vmem:[#allocation5 + $0x3c4] ss:$12 sps:$4 sm:$0xff]  }
  0x8f   :  { %1391 = vmatprep.subr.bf16.mxu0 %v4816_v7  ;;  %1433 = vmatpush1.bf16.msra.mxu1 %v4811_v8  ;;  %v4892_v7 = vld [vmem:[#allocation5 + $0x3c0] ss:$12 sps:$4 sm:$0xff]   ;;  %v4895_v8 = vld [vmem:[#allocation5 + $0xc8] ss:$12 sps:$4 sm:$0xff]  }
  0x90   :  { %1464 = vmatprep.mubr.bf16.mxu1 %v5414_v13  ;;  %1434 = vmatprep.subr.bf16.mxu1 %v4819_v9  ;;  %v4899_v9 = vld [vmem:[#allocation5 + $0x8] ss:$12 sps:$4 sm:$0xff]  }
  0x91   :  { %1421 = vmatprep.mubr.bf16.mxu0 %v5525_v41 }
  0x92   :  { %1392 = vmatpush1.bf16.msra.mxu0 %v4814_v10  ;;  %v5530_v10 = vld [vmem:[#allocation2 + $0x10] ss:$28 sps:$4 sm:$0xff]  }
  0x93   :  { %1393 = vmatprep.subr.bf16.mxu0 %v4822_v11  ;;  %1435 = vmatpush1.bf16.msra.mxu1 %v4817_v12  ;;  %v4900_v11 = vld [vmem:[#allocation5 + $0x2f0] ss:$12 sps:$4 sm:$0xff]  }
  0x94   :  { %1436 = vmatprep.subr.bf16.mxu1 %v4825_v14  ;;  %v4901_v12 = vld [vmem:[#allocation5 + $0x230] ss:$12 sps:$4 sm:$0xff]  }
  0x95   :  { %v4902_v14 = vld [vmem:[#allocation5 + $0x470] ss:$12 sps:$4 sm:$0xff]  }
  0x96   :  { %1394 = vmatpush1.bf16.msra.mxu0 %v4820_v15  ;;  %v4903_v15 = vld [vmem:[#allocation5 + $0x3b0] ss:$12 sps:$4 sm:$0xff]  }
  0x97   :  { %1395 = vmatprep.subr.bf16.mxu0 %v4828_v16  ;;  %1437 = vmatpush1.bf16.msra.mxu1 %v4823_v17  ;;  %v4904_v16 = vld [vmem:[#allocation5 + $0x2d8] ss:$12 sps:$4 sm:$0xff]  }
  0x98   :  { %1438 = vmatprep.subr.bf16.mxu1 %v4831_v18  ;;  %v4905_v17 = vld [vmem:[#allocation5 + $0x218] ss:$12 sps:$4 sm:$0xff]  }
  0x99   :  { %v4906_v18 = vld [vmem:[#allocation5 + $0x458] ss:$12 sps:$4 sm:$0xff]  }
  0x9a   :  { %1396 = vmatpush1.bf16.msra.mxu0 %v4826_v19  ;;  %v4907_v19 = vld [vmem:[#allocation5 + $0x398] ss:$12 sps:$4 sm:$0xff]  }
  0x9b   :  { %1397 = vmatprep.subr.bf16.mxu0 %v4834_v20  ;;  %1439 = vmatpush1.bf16.msra.mxu1 %v4829_v21  ;;  %v4908_v20 = vld [vmem:[#allocation5 + $0x2c0] ss:$12 sps:$4 sm:$0xff]  }
  0x9c   :  { %1440 = vmatprep.subr.bf16.mxu1 %v4837_v22  ;;  %v4909_v21 = vld [vmem:[#allocation5 + $0x200] ss:$12 sps:$4 sm:$0xff]  }
  0x9d   :  { %v4910_v22 = vld [vmem:[#allocation5 + $0x440] ss:$12 sps:$4 sm:$0xff]  }
  0x9e   :  { %1398 = vmatpush1.bf16.msra.mxu0 %v4832_v23  ;;  %v4911_v23 = vld [vmem:[#allocation5 + $0x380] ss:$12 sps:$4 sm:$0xff]  }
  0x9f   :  { %1399 = vmatprep.subr.bf16.mxu0 %v4840_v24  ;;  %1441 = vmatpush1.bf16.msra.mxu1 %v4835_v25  ;;  %v4912_v24 = vld [vmem:[#allocation5 + $0x2a8] ss:$12 sps:$4 sm:$0xff]  }
  0xa0   :  { %1442 = vmatprep.subr.bf16.mxu1 %v4843_v26  ;;  %v4914_v25 = vld [vmem:[#allocation5 + $0x428] ss:$12 sps:$4 sm:$0xff]  }
  0xa1   :  { %v4913_v26 = vld [vmem:[#allocation5 + $0x1e8] ss:$12 sps:$4 sm:$0xff]  }
  0xa2   :  { %1400 = vmatpush1.bf16.msra.mxu0 %v4838_v27  ;;  %v4918_v27 = vld [vmem:[#allocation5 + $0x410] ss:$12 sps:$4 sm:$0xff]  }
  0xa3   :  { %1401 = vmatprep.subr.bf16.mxu0 %v4846_v28  ;;  %1443 = vmatpush1.bf16.msra.mxu1 %v4841_v29  ;;  %v4917_v28 = vld [vmem:[#allocation5 + $0x1d0] ss:$12 sps:$4 sm:$0xff]   ;;  %v4920_v29 = vld [vmem:[#allocation5 + $0x278] ss:$12 sps:$4 sm:$0xff]  }
  0xa4   :  { %1444 = vmatprep.subr.bf16.mxu1 %v4849_v30  ;;  %v4919_v30 = vld [vmem:[#allocation5 + $0x350] ss:$12 sps:$4 sm:$0xff]  }
  0xa6   :  { %1402 = vmatpush1.bf16.msra.mxu0 %v4844_v31  ;;  %v4922_v31 = vld [vmem:[#allocation5 + $0x3f8] ss:$12 sps:$4 sm:$0xff]  }
  0xa7   :  { %1403 = vmatprep.subr.bf16.mxu0 %v4852_v33  ;;  %1445 = vmatpush1.bf16.msra.mxu1 %v4847_v32  ;;  %v4921_v32 = vld [vmem:[#allocation5 + $0x1b8] ss:$12 sps:$4 sm:$0xff]  }
  0xa8   :  { %1446 = vmatprep.subr.bf16.mxu1 %v4855_v35  ;;  %v4923_v33 = vld [vmem:[#allocation5 + $0x338] ss:$12 sps:$4 sm:$0xff]   ;;  %v4925_v35 = vld [vmem:[#allocation5 + $0x1a0] ss:$12 sps:$4 sm:$0xff]  }
  0xaa   :  { %1404 = vmatpush1.bf16.msra.mxu0 %v4850_v34  ;;  %v4924_v34 = vld [vmem:[#allocation5 + $0x260] ss:$12 sps:$4 sm:$0xff]  }
  0xab   :  { %1405 = vmatprep.subr.bf16.mxu0 %v4858_v37  ;;  %1447 = vmatpush1.bf16.msra.mxu1 %v4853_v36  ;;  %v4926_v36 = vld [vmem:[#allocation5 + $0x3e0] ss:$12 sps:$4 sm:$0xff]   ;;  %v4928_v37 = vld [vmem:[#allocation5 + $0x248] ss:$12 sps:$4 sm:$0xff]  }
  0xac   :  { %4389 = vmatprep.subr.bf16.mxu1 %v4859_v39  ;;  %v4930_v39 = vld [vmem:[#allocation5 + $0x3c8] ss:$12 sps:$4 sm:$0xff]  }
  0xae   :  { %1406 = vmatpush2.bf16.msra.mxu0 %v4856_v38  ;;  %1465 = vmatmul.mubr.bf16.vlgmr.msra.gmra.mxu1 %v5523_v40  ;;  %v4927_v38 = vld [vmem:[#allocation5 + $0x320] ss:$12 sps:$4 sm:$0xff]  }
  0xaf   :  { %1407 = vmatprep.subr.bf16.mxu0 %v4864_v43  ;;  %4390 = vmatpush3.bf16.msra.mxu1 %v4861_v42  ;;  %v4931_v42 = vld [vmem:[#allocation5 + $0x308] ss:$12 sps:$4 sm:$0xff]   ;;  %v4942_v43 = vld [vmem:[#allocation7 + $0xac] ss:$12 sps:$4 sm:$0xff]  }
  0xb0   :  { %1507 = vmatprep.mubr.bf16.mxu1 %v5510_v47  ;;  %4391 = vmatprep.subr.bf16.mxu1 %v4865_v45  ;;  %v4881_v47 = vld [vmem:[#allocation5 + $0x50] ss:$12 sps:$4 sm:$0xff]   ;;  %v4940_v45 = vld [vmem:[#allocation7 + $0xa8] ss:$12 sps:$4 sm:$0xff]  }
  0xb2   :  { %1408 = vmatpush2.bf16.msra.mxu0 %v4862_v44  ;;  %v4932_v44 = vld [vmem:[#allocation5 + $0x530] ss:$12 sps:$4 sm:$0xff]  }
  0xb3   :  { %1409 = vmatprep.subr.bf16.mxu0 %v4869_v48  ;;  %4392 = vmatpush3.bf16.msra.mxu1 %v4866_v46  ;;  %v5415_v46 = vmov 0.0   ;;  %v4945_v48 = vld [vmem:[#allocation7 + $0x94] ss:$12 sps:$4 sm:$0xff]  }
  0xb4   :  { %4393 = vmatprep.subr.bf16.mxu1 %v4870_v50  ;;  %v4943_v50 = vld [vmem:[#allocation7 + $0x90] ss:$12 sps:$4 sm:$0xff]  }
  0xb6   :  { %1410 = vmatpush2.bf16.msra.mxu0 %v4867_v49  ;;  %v4933_v49 = vld [vmem:[#allocation5 + $0x518] ss:$12 sps:$4 sm:$0xff]  }
  0xb7   :  { %1411 = vmatprep.subr.bf16.mxu0 %v4874_v53  ;;  %4394 = vmatpush3.bf16.msra.mxu1 %v4871_v52  ;;  %v4934_v52 = vld [vmem:[#allocation5 + $0x500] ss:$12 sps:$4 sm:$0xff]   ;;  %v4948_v53 = vld [vmem:[#allocation7 + $0x7c] ss:$12 sps:$4 sm:$0xff]  }
  0xb8   :  { %4395 = vmatprep.subr.bf16.mxu1 %v4875_v55  ;;  %v4951_v55 = vld [vmem:[#allocation7 + $0x64] ss:$12 sps:$4 sm:$0xff]  }
  0xba   :  { %1412 = vmatpush2.bf16.msra.mxu0 %v4872_v54  ;;  %v4946_v54 = vld [vmem:[#allocation7 + $0x78] ss:$12 sps:$4 sm:$0xff]  }
  0xbb   :  { %1413 = vmatprep.subr.bf16.mxu0 %v4879_v57  ;;  %4396 = vmatpush3.bf16.msra.mxu1 %v4876_v56  ;;  %v4949_v56 = vld [vmem:[#allocation7 + $0x60] ss:$12 sps:$4 sm:$0xff]  }
  0xbc   :  { %4397 = vmatprep.subr.bf16.mxu1 %v4880_v59  ;;  %v4954_v57 = vld [vmem:[#allocation7 + $0x4c] ss:$12 sps:$4 sm:$0xff]   ;;  %v4952_v59 = vld [vmem:[#allocation7 + $0x48] ss:$12 sps:$4 sm:$0xff]  }
  0xbe   :  { %1414 = vmatpush2.bf16.msra.mxu0 %v4877_v58  ;;  %v4936_v58 = vld [vmem:[#allocation5 + $0x4d0] ss:$12 sps:$4 sm:$0xff]  }
  0xbf   :  { %1415 = vmatprep.subr.bf16.mxu0 %v4884_v60  ;;  %4398 = vmatpush3.bf16.msra.mxu1 %v4881_v47  ;;  %v4957_v47 = vld [vmem:[#allocation7 + $0x34] ss:$12 sps:$4 sm:$0xff]   ;;  %v4937_v60 = vld [vmem:[#allocation5 + $0x4b8] ss:$12 sps:$4 sm:$0xff]  }
  0xc0   :  { %4399 = vmatprep.subr.bf16.mxu1 %v4885_v62  ;;  %v4960_v62 = vld [vmem:[#allocation7 + $0x1c] ss:$12 sps:$4 sm:$0xff]  }
  0xc2   :  { %1416 = vmatpush2.bf16.msra.mxu0 %v4882_v61  ;;  %v4955_v61 = vld [vmem:[#allocation7 + $0x30] ss:$12 sps:$4 sm:$0xff]  }
  0xc3   :  { %1417 = vmatprep.subr.bf16.mxu0 %v4889_v0  ;;  %4400 = vmatpush3.bf16.msra.mxu1 %v4886_v63  ;;  %v4938_v63 = vld [vmem:[#allocation5 + $0x4a0] ss:$12 sps:$4 sm:$0xff]   ;;  %v4958_v0 = vld [vmem:[#allocation7 + $0x18] ss:$12 sps:$4 sm:$0xff]  }
  0xc4   :  { %4401 = vmatprep.subr.bf16.mxu1 %v4890_v2  ;;  %v4939_v2 = vld [vmem:[#allocation5 + $0x488] ss:$12 sps:$4 sm:$0xff]  }
  0xc6   :  { %1418 = vmatpush2.bf16.msra.mxu0 %v4887_v1  ;;  %v4963_v1 = vld [vmem:[#allocation7 + $0x4] ss:$12 sps:$4 sm:$0xff]  }
  0xc7   :  { %1419 = vmatprep.subr.bf16.mxu0 %v4894_v5  ;;  %4402 = vmatpush3.bf16.msra.mxu1 %v4891_v4  ;;  %v4961_v4 = vld [vmem:[#allocation7] ss:$12 sps:$4 sm:$0xff]  }
  0xc8   :  { %4403 = vmatprep.subr.bf16.mxu1 %v4895_v8  ;;  %v4966_v5 = vld [vmem:[#allocation7 + $0x16c] ss:$12 sps:$4 sm:$0xff]   ;;  %v4969_v8 = vld [vmem:[#allocation7 + $0x154] ss:$12 sps:$4 sm:$0xff]  }
  0xca   :  { %1420 = vmatpush2.bf16.msra.mxu0 %v4892_v7  ;;  %v4964_v7 = vld [vmem:[#allocation7 + $0x168] ss:$12 sps:$4 sm:$0xff]  }
  0xcb   :  { %4411 = vmatprep.subr.bf16.mxu0 %v4900_v11  ;;  %4404 = vmatpush3.bf16.msra.mxu1 %v4899_v9  ;;  %v4967_v9 = vld [vmem:[#allocation7 + $0x150] ss:$12 sps:$4 sm:$0xff]   ;;  %v4970_v11 = vld [vmem:[#allocation7 + $0x138] ss:$12 sps:$4 sm:$0xff]  }
  0xcc   :  { %4433 = vmatprep.subr.bf16.mxu1 %v4902_v14  ;;  %v4973_v14 = vld [vmem:[#allocation7 + $0x120] ss:$12 sps:$4 sm:$0xff]  }
  0xcd   :  { %1422 = vmatmul.mubr.bf16.vlgmr.msra.gmra.mxu0 %v5530_v10 }
  0xce   :  { %4412 = vmatpush3.bf16.msra.mxu0 %v4901_v12  ;;  %1548 = vmatprep.mubr.bf16.mxu0 %v5513_v51  ;;  %v4916_v51 = vld [vmem:[#allocation5 + $0x290] ss:$12 sps:$4 sm:$0xff]  }
  0xcf   :  { %1508 = vmatmul.mubr.bf16.vlgmr.msra.gmra.mxu1 %v5516_v3  ;;  %4413 = vmatprep.subr.bf16.mxu0 %v4904_v16  ;;  %v4915_v3 = vld [vmem:[#allocation5 + $0x368] ss:$12 sps:$4 sm:$0xff]   ;;  %v4975_v12 = vld [vmem:[#allocation7 + $0x124] ss:$12 sps:$4 sm:$0xff]  }
  0xd0   :  { %4434 = vmatpush3.bf16.msra.mxu1 %v4903_v15  ;;  %1589 = vmatprep.mubr.bf16.mxu1 %v5525_v41  ;;  %v4929_v41 = vld [vmem:[#allocation5 + $0x188] ss:$12 sps:$4 sm:$0xff]   ;;  %v4978_v15 = vld [vmem:[#allocation7 + $0x10c] ss:$12 sps:$4 sm:$0xff]  }
  0xd1   :  { %4435 = vmatprep.subr.bf16.mxu1 %v4906_v18  ;;  %v4976_v16 = vld [vmem:[#allocation7 + $0x108] ss:$12 sps:$4 sm:$0xff]  }
  0xd2   :  { %4414 = vmatpush3.bf16.msra.mxu0 %v4905_v17  ;;  %v4981_v17 = vld [vmem:[#allocation7 + $0xf4] ss:$12 sps:$4 sm:$0xff]   ;;  %v4984_v18 = vld [vmem:[#allocation7 + $0xdc] ss:$12 sps:$4 sm:$0xff]  }
  0xd3   :  { %4415 = vmatprep.subr.bf16.mxu0 %v4908_v20  ;;  %v4987_v20 = vld [vmem:[#allocation7 + $0xc4] ss:$12 sps:$4 sm:$0xff]  }
  0xd4   :  { %4436 = vmatpush3.bf16.msra.mxu1 %v4907_v19  ;;  %v4982_v19 = vld [vmem:[#allocation7 + $0xd8] ss:$12 sps:$4 sm:$0xff]  }
  0xd5   :  { %4437 = vmatprep.subr.bf16.mxu1 %v4910_v22  ;;  %v4990_v22 = vld [vmem:[#allocation7 + $0x22c] ss:$12 sps:$4 sm:$0xff]  }
  0xd6   :  { %4416 = vmatpush3.bf16.msra.mxu0 %v4909_v21  ;;  %v4985_v21 = vld [vmem:[#allocation7 + $0xc0] ss:$12 sps:$4 sm:$0xff]  }
  0xd7   :  { %4417 = vmatprep.subr.bf16.mxu0 %v4912_v24  ;;  %v4994_v24 = vld [vmem:[#allocation7 + $0x214] ss:$12 sps:$4 sm:$0xff]  }
  0xd8   :  { %4438 = vmatpush3.bf16.msra.mxu1 %v4911_v23  ;;  %v4988_v23 = vld [vmem:[#allocation7 + $0x228] ss:$12 sps:$4 sm:$0xff]  }
  0xd9   :  { %4439 = vmatprep.subr.bf16.mxu1 %v4914_v25  ;;  %v4992_v25 = vld [vmem:[#allocation7 + $0x210] ss:$12 sps:$4 sm:$0xff]  }
  0xda   :  { %4418 = vmatpush3.bf16.msra.mxu0 %v4913_v26  ;;  %v4998_v26 = vld [vmem:[#allocation7 + $0x1fc] ss:$12 sps:$4 sm:$0xff]  }
  0xdb   :  { %4419 = vmatprep.subr.bf16.mxu0 %v4916_v51  ;;  %v4996_v51 = vld [vmem:[#allocation7 + $0x1f8] ss:$12 sps:$4 sm:$0xff]  }
  0xdc   :  { %4440 = vmatpush3.bf16.msra.mxu1 %v4915_v3  ;;  %v5002_v3 = vld [vmem:[#allocation7 + $0x1e4] ss:$12 sps:$4 sm:$0xff]  }
  0xdd   :  { %4441 = vmatprep.subr.bf16.mxu1 %v4918_v27  ;;  %v5000_v27 = vld [vmem:[#allocation7 + $0x1e0] ss:$12 sps:$4 sm:$0xff]  }
  0xde   :  { %4420 = vmatpush3.bf16.msra.mxu0 %v4917_v28  ;;  %v5006_v28 = vld [vmem:[#allocation7 + $0x1cc] ss:$12 sps:$4 sm:$0xff]  }
  0xdf   :  { %4421 = vmatprep.subr.bf16.mxu0 %v4920_v29  ;;  %v5004_v29 = vld [vmem:[#allocation7 + $0x1c8] ss:$12 sps:$4 sm:$0xff]  }
  0xe0   :  { %4442 = vmatpush3.bf16.msra.mxu1 %v4919_v30  ;;  %v5010_v30 = vld [vmem:[#allocation7 + $0x1b4] ss:$12 sps:$4 sm:$0xff]  }
  0xe1   :  { %4443 = vmatprep.subr.bf16.mxu1 %v4922_v31  ;;  %v5008_v31 = vld [vmem:[#allocation7 + $0x1b0] ss:$12 sps:$4 sm:$0xff]  }
  0xe2   :  { %4422 = vmatpush3.bf16.msra.mxu0 %v4921_v32  ;;  %v5014_v32 = vld [vmem:[#allocation7 + $0x19c] ss:$12 sps:$4 sm:$0xff]  }
  0xe3   :  { %4423 = vmatprep.subr.bf16.mxu0 %v4924_v34  ;;  %v5018_v34 = vld [vmem:[#allocation7 + $0x184] ss:$12 sps:$4 sm:$0xff]  }
  0xe4   :  { %4444 = vmatpush3.bf16.msra.mxu1 %v4923_v33  ;;  %v5012_v33 = vld [vmem:[#allocation7 + $0x198] ss:$12 sps:$4 sm:$0xff]  }
  0xe5   :  { %4445 = vmatprep.subr.bf16.mxu1 %v4926_v36  ;;  %v5020_v36 = vld [vmem:[#allocation7 + $0x170] ss:$12 sps:$4 sm:$0xff]  }
  0xe6   :  { %4424 = vmatpush3.bf16.msra.mxu0 %v4925_v35  ;;  %v5016_v35 = vld [vmem:[#allocation7 + $0x180] ss:$12 sps:$4 sm:$0xff]  }
  0xe7   :  { %4425 = vmatprep.subr.bf16.mxu0 %v4928_v37  ;;  %v356_v37 = vlaneseq }
  0xe8   :  { %4446 = vmatpush3.bf16.msra.mxu1 %v4927_v38 }
  0xe9   :  { %4447 = vmatprep.subr.bf16.mxu1 %v4930_v39  ;;  %v5551_v39 = vshrl.u32 %v356_v37, 7 }
  0xea   :  { %4426 = vmatpush3.bf16.msra.mxu0 %v4929_v41 }
  0xeb   :  { %4588 = vmatprep.subr.bf16.mxu0 %v5415_v46 }
  0xec   :  { %4448 = vmatpush3.bf16.msra.mxu1 %v4931_v42 }
  0xed   :  { %1549 = vmatmul.mubr.bf16.vlgmr.msra.gmra.mxu0 %v5518_v6  ;;  %2145 = vmatprep.subr.bf16.mxu1 %v4942_v43  ;;  %v4935_v6 = vld [vmem:[#allocation5 + $0x4e8] ss:$12 sps:$4 sm:$0xff]   ;;  %v5554_v43 = vsub.s32 1, %v5551_v39 }
  0xee   :  { %4589 = vmatpush3.bf16.msra.mxu0 %v4932_v44  ;;  %4604 = vmatprep.mubr.msk.bf16.mxu0 %vm5416_vm0, %v5415_v46  ;;  %v5559_v44 = vld [vmem:[%s5656_s2] sm:$0x7] }
  0xef   :  { %1590 = vmatmul.mubr.bf16.vlgmr.msra.gmra.mxu1 %v5530_v10  ;;  %4590 = vmatprep.subr.bf16.mxu0 %v5415_v46  ;;  %v4972_v10 = vld [vmem:[#allocation7 + $0x13c] ss:$12 sps:$4 sm:$0xff]  }
  0xf0   :  { %2146 = vmatpush1.bf16.msra.mxu1 %v4940_v45  ;;  %v5562_v45 = vsub.s32 0, %v5551_v39 }
  0xf1   :  { %2147 = vmatprep.subr.bf16.mxu1 %v4945_v48 }
  0xf2   :  { %4591 = vmatpush3.bf16.msra.mxu0 %v4933_v49 }
  0xf3   :  { %4592 = vmatprep.subr.bf16.mxu0 %v5415_v46 }
  0xf4   :  { %2148 = vmatpush1.bf16.msra.mxu1 %v4943_v50  ;;  %v363_v50 = vrot.slane %v5559_v44, %v5554_v43 }
  0xf5   :  { %2149 = vmatprep.subr.bf16.mxu1 %v4948_v53 }
  0xf6   :  { %4593 = vmatpush3.bf16.msra.mxu0 %v4934_v52  ;;  %v359_v52 = vrot.slane %v5559_v44, %v5562_v45 }
  0xf7   :  { %4594 = vmatprep.subr.bf16.mxu0 %v5415_v46 }
  0xf8   :  { %2150 = vmatpush1.bf16.msra.mxu1 %v4946_v54 }
  0xf9   :  { %2151 = vmatprep.subr.bf16.mxu1 %v4951_v55 }
  0xfa   :  { %4595 = vmatpush3.bf16.msra.mxu0 %v4935_v6 }
  0xfb   :  { %4596 = vmatprep.subr.bf16.mxu0 %v5415_v46 }
  0xfc   :  { %2152 = vmatpush1.bf16.msra.mxu1 %v4949_v56 }
  0xfd   :  { %2153 = vmatprep.subr.bf16.mxu1 %v4954_v57 }
  0xfe   :  { %4597 = vmatpush3.bf16.msra.mxu0 %v4936_v58 }
  0xff   :  { %4598 = vmatprep.subr.bf16.mxu0 %v5415_v46 }
 0x100   :  { %2154 = vmatpush1.bf16.msra.mxu1 %v4952_v59 }
 0x101   :  { %2155 = vmatprep.subr.bf16.mxu1 %v4957_v47 }
 0x102   :  { %4599 = vmatpush3.bf16.msra.mxu0 %v4937_v60 }
 0x103   :  { %4600 = vmatprep.subr.bf16.mxu0 %v5415_v46 }
 0x104   :  { %2156 = vmatpush1.bf16.msra.mxu1 %v4955_v61 }
 0x105   :  { %2157 = vmatprep.subr.bf16.mxu1 %v4960_v62 }
 0x106   :  { %4601 = vmatpush3.bf16.msra.mxu0 %v4938_v63 }
 0x107   :  { %4602 = vmatprep.subr.bf16.mxu0 %v5415_v46 }
 0x108   :  { %2158 = vmatpush1.bf16.msra.mxu1 %v4958_v0 }
 0x109   :  { %2159 = vmatprep.subr.bf16.mxu1 %v4963_v1 }
 0x10a   :  { %4603 = vmatpush3.bf16.msra.mxu0 %v4939_v2 }
 0x10b   :  { %2188 = vmatprep.subr.bf16.mxu0 %v4990_v22 }
 0x10c   :  { %2160 = vmatpush1.bf16.msra.mxu1 %v4961_v4 }
 0x10d   :  { %4605 = vmatmul.mubr.bf16.vlgmr.msra.gmra.mxu0 %v5523_v40  ;;  %2161 = vmatprep.subr.bf16.mxu1 %v4966_v5  ;;  %v4979_v40 = vld [vmem:[#allocation7 + $0xf0] ss:$12 sps:$4 sm:$0xff]  }
 0x10e   :  { %2220 = vmatprep.mubr.bf16.mxu0 %v5414_v13  ;;  %2189 = vmatpush1.bf16.msra.mxu0 %v4988_v23  ;;  %v4995_v23 = vld [vmem:[#allocation7 + $0x218] ss:$12 sps:$4 sm:$0xff]  }
 0x10f   :  { %2190 = vmatprep.subr.bf16.mxu0 %v4994_v24  ;;  %v4999_v24 = vld [vmem:[#allocation7 + $0x200] ss:$12 sps:$4 sm:$0xff]  }
 0x110   :  { %2162 = vmatpush2.bf16.msra.mxu1 %v4964_v7 }
 0x111   :  { %2163 = vmatprep.subr.bf16.mxu1 %v4969_v8 }
 0x112   :  { %2191 = vmatpush1.bf16.msra.mxu0 %v4992_v25  ;;  %v5003_v25 = vld [vmem:[#allocation7 + $0x1e8] ss:$12 sps:$4 sm:$0xff]  }
 0x113   :  { %2192 = vmatprep.subr.bf16.mxu0 %v4998_v26  ;;  %v5007_v26 = vld [vmem:[#allocation7 + $0x1d0] ss:$12 sps:$4 sm:$0xff]  }
 0x114   :  { %2164 = vmatpush2.bf16.msra.mxu1 %v4967_v9 }
 0x115   :  { %2165 = vmatprep.subr.bf16.mxu1 %v4972_v10 }
 0x116   :  { %2193 = vmatpush1.bf16.msra.mxu0 %v4996_v51  ;;  %v5011_v51 = vld [vmem:[#allocation7 + $0x1b8] ss:$12 sps:$4 sm:$0xff]  }
 0x117   :  { %2194 = vmatprep.subr.bf16.mxu0 %v5002_v3 }
 0x118   :  { %2166 = vmatpush2.bf16.msra.mxu1 %v4970_v11 }
 0x119   :  { %2167 = vmatprep.subr.bf16.mxu1 %v4975_v12 }
 0x11a   :  { %2195 = vmatpush1.bf16.msra.mxu0 %v5000_v27  ;;  %v5015_v27 = vld [vmem:[#allocation7 + $0x1a0] ss:$12 sps:$4 sm:$0xff]  }
 0x11b   :  { %2196 = vmatprep.subr.bf16.mxu0 %v5006_v28 }
 0x11c   :  { %2168 = vmatpush2.bf16.msra.mxu1 %v4973_v14 }
 0x11d   :  { %2169 = vmatprep.subr.bf16.mxu1 %v4978_v15 }
 0x11e   :  { %2197 = vmatpush1.bf16.msra.mxu0 %v5004_v29  ;;  %v5019_v29 = vld [vmem:[#allocation7 + $0x188] ss:$12 sps:$4 sm:$0xff]  }
 0x11f   :  { %2198 = vmatprep.subr.bf16.mxu0 %v5010_v30 }
 0x120   :  { %2170 = vmatpush2.bf16.msra.mxu1 %v4976_v16 }
 0x121   :  { %2171 = vmatprep.subr.bf16.mxu1 %v4981_v17 }
 0x122   :  { %2199 = vmatpush1.bf16.msra.mxu0 %v5008_v31 }
 0x123   :  { %2200 = vmatprep.subr.bf16.mxu0 %v5014_v32 }
 0x124   :  { %2172 = vmatpush2.bf16.msra.mxu1 %v4979_v40 }
 0x125   :  { %2173 = vmatprep.subr.bf16.mxu1 %v4984_v18 }
 0x126   :  { %2201 = vmatpush1.bf16.msra.mxu0 %v5012_v33 }
 0x127   :  { %2202 = vmatprep.subr.bf16.mxu0 %v5018_v34 }
 0x128   :  { %2174 = vmatpush2.bf16.msra.mxu1 %v4982_v19 }
 0x129   :  { %2175 = vmatprep.subr.bf16.mxu1 %v4987_v20 }
 0x12a   :  { %2203 = vmatpush1.bf16.msra.mxu0 %v5016_v35  ;;  %v5584_v35 = vsub.s32 2, %v5551_v39 }
 0x12b   :  { %4464 = vmatprep.subr.bf16.mxu0 %v5020_v36 }
 0x12c   :  { %2176 = vmatpush2.bf16.msra.mxu1 %v4985_v21  ;;  %v4991_v21 = vld [vmem:[#allocation7 + $0x230] ss:$12 sps:$4 sm:$0xff]  }
 0x12d   :  { %4608 = vmatprep.subr.bf16.mxu1 %v5415_v46 }
 0x14d   :  { %v1337_v41 = vpop.f32.mrf.mxu0 }
 0x14e   :  { %v1380_v38 = vpop.f32.mrf.mxu1  ;;  %v1338_v56 = vadd.f32 %v1337_v41, %v359_v52 }
 0x14f   :  { %v1339_v48 = vpop.f32.mrf.mxu0 }
 0x150   :  { %v1382_v42 = vpop.f32.mrf.mxu1  ;;  %v1340_v55 = vadd.f32 %v1339_v48, %v363_v50  ;;  %v1381_v62 = vadd.f32 %v1380_v38, %v1338_v56  ;;  %v367_v38 = vrot.slane %v5559_v44, %v5584_v35 }
 0x151   :  { %v1341_v53 = vpop.f32.mrf.mxu0 }
 0x152   :  { %v1384_v49 = vpop.f32.mrf.mxu1  ;;  %v1342_v58 = vadd.f32 %v1341_v53, %v359_v52  ;;  %v1383_v60 = vadd.f32 %v1382_v42, %v1340_v55 }
 0x153   :  { %v1343_v57 = vpop.f32.mrf.mxu0 }
 0x154   :  { %v1386_v54 = vpop.f32.mrf.mxu1  ;;  %v1344_v61 = vadd.f32 %v1343_v57, %v363_v50  ;;  %v1385_v0 = vadd.f32 %v1384_v49, %v1342_v58 }
 0x156   :  { %v1387_v7 = vadd.f32 %v1386_v54, %v1344_v61 }
 0x16e   :  { %v1466_v6 = vpop.f32.mrf.mxu1 }
 0x170   :  { %v1468_v59 = vpop.f32.mrf.mxu1 }
 0x172   :  { %v1470_v2 = vpop.f32.mrf.mxu1 }
 0x174   :  { %v1472_v14 = vpop.f32.mrf.mxu1 }
 0x18d   :  { %v1423_v47 = vpop.f32.mrf.mxu0 }
 0x18e   :  { %v1424_v4 = vadd.f32 %v1423_v47, %v1381_v62 }
 0x18f   :  { %v1425_v63 = vpop.f32.mrf.mxu0  ;;  %v4405_v3 = vpop.f32.mrf.mxu1 }
 0x190   :  { %v1426_v1 = vadd.f32 %v1425_v63, %v1383_v60  ;;  %v1467_v15 = vadd.f32 %v1466_v6, %v1424_v4 }
 0x191   :  { %v1427_v5 = vpop.f32.mrf.mxu0  ;;  %v4406_v28 = vpop.f32.mrf.mxu1 }
 0x192   :  { %v1428_v8 = vadd.f32 %v1427_v5, %v1385_v0  ;;  %v1469_v10 = vadd.f32 %v1468_v59, %v1426_v1  ;;  %v1639_v19 = vmax.f32 %v1467_v15, 0.0  ;;  %v4407_v41 = vadd.f32 %v4406_v28, %v4405_v3  ;;  %v5022_v5 = vld [vmem:[#allocation7 + $0x158] ss:$12 sps:$4 sm:$0xff]   ;;  %v5045_v3 = vld [vmem:[#allocation8 + $0x60] ss:$12 sps:$4 sm:$0xff]  }
 0x193   :  { %v1429_v9 = vpop.f32.mrf.mxu0  ;;  %v4408_v30 = vpop.f32.mrf.mxu1  ;;  %v5030_v15 = vld [vmem:[#allocation7 + $0xf8] ss:$12 sps:$4 sm:$0xff]   ;;  %v5048_v28 = vld [vmem:[#allocation8 + $0x48] ss:$12 sps:$4 sm:$0xff]  }
 0x194   :  { %v1471_v11 = vadd.f32 %v1470_v2, %v1428_v8  ;;  %v1430_v12 = vadd.f32 %v1429_v9, %v1387_v7  ;;  %v1640_v40 = vmax.f32 %v1469_v10, 0.0  ;;  %v1510_v52 = vadd.f32 %v4407_v41, %v367_v38  ;;  %v5021_v2 = vld [vmem:[#allocation7 + $0xb0] ss:$12 sps:$4 sm:$0xff]   ;;  %v5023_v7 = vld [vmem:[#allocation7 + $0x98] ss:$12 sps:$4 sm:$0xff]  }
 0x195   :  { %v4409_v32 = vpop.f32.mrf.mxu1  ;;  %v5024_v8 = vld [vmem:[#allocation7 + $0x140] ss:$12 sps:$4 sm:$0xff]   ;;  %v5026_v10 = vld [vmem:[#allocation7 + $0x128] ss:$12 sps:$4 sm:$0xff]  }
 0x196   :  { %v1473_v16 = vadd.f32 %v1472_v14, %v1430_v12  ;;  %v1642_v17 = vmax.f32 %v1471_v11, 0.0  ;;  %v4410_v49 = vadd.f32 %v4409_v32, %v4408_v30  ;;  %v5025_v9 = vld [vmem:[#allocation7 + $0x80] ss:$12 sps:$4 sm:$0xff]   ;;  %v5027_v11 = vld [vmem:[#allocation7 + $0x68] ss:$12 sps:$4 sm:$0xff]  }
 0x197   :  { %v5028_v12 = vld [vmem:[#allocation7 + $0x110] ss:$12 sps:$4 sm:$0xff]  }
 0x198   :  { %v1643_v18 = vmax.f32 %v1473_v16, 0.0  ;;  %v5570_v22 = vpack.c.bf16 %v1642_v17, %v1639_v19  ;;  %v1513_v6 = vadd.f32 %v4410_v49, %v367_v38  ;;  %v5029_v14 = vld [vmem:[#allocation7 + $0x50] ss:$12 sps:$4 sm:$0xff]   ;;  %v5031_v16 = vld [vmem:[#allocation7 + $0x38] ss:$12 sps:$4 sm:$0xff]  }
 0x199   :  { %v5032_v17 = vld [vmem:[#allocation7 + $0xe0] ss:$12 sps:$4 sm:$0xff]   ;;  %v5035_v19 = vld [vmem:[#allocation7 + $0x8] ss:$12 sps:$4 sm:$0xff]   ;;  %v5051_v30 = vld [vmem:[#allocation8 + $0x30] ss:$12 sps:$4 sm:$0xff]  }
 0x19a   :  { %v5568_v20 = vpack.c.bf16 %v1643_v18, %v1640_v40  ;;  %v5033_v40 = vld [vmem:[#allocation7 + $0x20] ss:$12 sps:$4 sm:$0xff]   ;;  %v5034_v18 = vld [vmem:[#allocation7 + $0xc8] ss:$12 sps:$4 sm:$0xff]   ;;  %v5059_v32 = vld [vmem:[#allocation8 + $0x4] ss:$12 sps:$4 sm:$0xff]  }
 0x19b   :  { %v5063_v38 = vld [vmem:[#allocation8 + $0x150] ss:$12 sps:$4 sm:$0xff]   ;;  %v5069_v49 = vld [vmem:[#allocation8 + $0x120] ss:$12 sps:$4 sm:$0xff]  }
 0x19c   :  { %2177 = vmatprep.mubr.bf16.mxu1 %v5568_v20  ;;  %v5068_v41 = vld [vmem:[#allocation8 + $0x13c] ss:$12 sps:$4 sm:$0xff]  }
 0x19d   :  { %2178 = vmatmul.mubr.bf16.vlgmr.msra.gmra.mxu1 %v5570_v22 }
 0x19e   :  { %4609 = vmatpush3.bf16.msra.mxu1 %v4991_v21  ;;  %4624 = vmatprep.mubr.msk.bf16.mxu1 %vm5416_vm0, %v5415_v46  ;;  %v5036_v21 = vld [vmem:[#allocation8 + $0xa8] ss:$12 sps:$4 sm:$0xff]  }
 0x19f   :  { %4610 = vmatprep.subr.bf16.mxu1 %v5415_v46 }
 0x1a2   :  { %4611 = vmatpush3.bf16.msra.mxu1 %v4995_v23  ;;  %v5041_v23 = vld [vmem:[#allocation8 + $0x94] ss:$12 sps:$4 sm:$0xff]  }
 0x1a3   :  { %4612 = vmatprep.subr.bf16.mxu1 %v5415_v46 }
 0x1a6   :  { %4613 = vmatpush3.bf16.msra.mxu1 %v4999_v24  ;;  %v5039_v24 = vld [vmem:[#allocation8 + $0x90] ss:$12 sps:$4 sm:$0xff]  }
 0x1a7   :  { %4614 = vmatprep.subr.bf16.mxu1 %v5415_v46 }
 0x1aa   :  { %4615 = vmatpush3.bf16.msra.mxu1 %v5003_v25  ;;  %v5044_v25 = vld [vmem:[#allocation8 + $0x7c] ss:$12 sps:$4 sm:$0xff]  }
 0x1ab   :  { %4616 = vmatprep.subr.bf16.mxu1 %v5415_v46 }
 0x1ad   :  { %v4427_v31 = vpop.f32.mrf.mxu0 }
 0x1ae   :  { %4617 = vmatpush3.bf16.msra.mxu1 %v5007_v26  ;;  %v5042_v26 = vld [vmem:[#allocation8 + $0x78] ss:$12 sps:$4 sm:$0xff]  }
 0x1af   :  { %4618 = vmatprep.subr.bf16.mxu1 %v5415_v46  ;;  %v4428_v33 = vpop.f32.mrf.mxu0  ;;  %v4449_v34 = vpop.f32.mrf.mxu1 }
 0x1b0   :  { %v4429_v50 = vadd.f32 %v4428_v33, %v4427_v31  ;;  %v5054_v31 = vld [vmem:[#allocation8 + $0x18] ss:$12 sps:$4 sm:$0xff]   ;;  %v5057_v33 = vld [vmem:[#allocation8] ss:$12 sps:$4 sm:$0xff]  }
 0x1b1   :  { %v4430_v36 = vpop.f32.mrf.mxu0  ;;  %v4450_v37 = vpop.f32.mrf.mxu1 }
 0x1b2   :  { %4619 = vmatpush3.bf16.msra.mxu1 %v5011_v51  ;;  %v1551_v55 = vadd.f32 %v4429_v50, %v1510_v52  ;;  %v4451_v56 = vadd.f32 %v4450_v37, %v4449_v34  ;;  %v5047_v51 = vld [vmem:[#allocation8 + $0x64] ss:$12 sps:$4 sm:$0xff]   ;;  %v5062_v34 = vld [vmem:[#allocation8 + $0x16c] ss:$12 sps:$4 sm:$0xff]   ;;  %v5065_v37 = vld [vmem:[#allocation8 + $0x154] ss:$12 sps:$4 sm:$0xff]  }
 0x1b3   :  { %4620 = vmatprep.subr.bf16.mxu1 %v5415_v46  ;;  %v4431_v42 = vpop.f32.mrf.mxu0  ;;  %v4452_v48 = vpop.f32.mrf.mxu1  ;;  %v5074_v50 = vld [vmem:[#allocation8 + $0x10c] ss:$12 sps:$4 sm:$0xff]   ;;  %v5072_v52 = vld [vmem:[#allocation8 + $0x108] ss:$12 sps:$4 sm:$0xff]  }
 0x1b4   :  { %v4432_v53 = vadd.f32 %v4431_v42, %v4430_v36  ;;  %v1592_v59 = vadd.f32 %v4451_v56, %v1551_v55  ;;  %v5060_v36 = vld [vmem:[#allocation8 + $0x168] ss:$12 sps:$4 sm:$0xff]   ;;  %v5066_v42 = vld [vmem:[#allocation8 + $0x138] ss:$12 sps:$4 sm:$0xff]   ;;  %v5075_v56 = vld [vmem:[#allocation8 + $0xf0] ss:$12 sps:$4 sm:$0xff]  }
 0x1b5   :  { %v4453_v54 = vpop.f32.mrf.mxu1  ;;  %v5090_v55 = vld [vmem:[#allocation8 + $0x214] ss:$12 sps:$4 sm:$0xff]  }
 0x1b6   :  { %4621 = vmatpush3.bf16.msra.mxu1 %v5015_v27  ;;  %v1554_v57 = vadd.f32 %v4432_v53, %v1513_v6  ;;  %v4454_v58 = vadd.f32 %v4453_v54, %v4452_v48  ;;  %v5050_v27 = vld [vmem:[#allocation8 + $0x4c] ss:$12 sps:$4 sm:$0xff]   ;;  %v5071_v48 = vld [vmem:[#allocation8 + $0x124] ss:$12 sps:$4 sm:$0xff]   ;;  %v5077_v53 = vld [vmem:[#allocation8 + $0xf4] ss:$12 sps:$4 sm:$0xff]  }
 0x1b7   :  { %4622 = vmatprep.subr.bf16.mxu1 %v5415_v46  ;;  %v5084_v54 = vld [vmem:[#allocation8 + $0x228] ss:$12 sps:$4 sm:$0xff]   ;;  %v5086_v6 = vld [vmem:[#allocation8 + $0x22c] ss:$12 sps:$4 sm:$0xff]  }
 0x1b8   :  { %v1595_v61 = vadd.f32 %v4454_v58, %v1554_v57  ;;  %v5088_v57 = vld [vmem:[#allocation8 + $0x210] ss:$12 sps:$4 sm:$0xff]  }
 0x1b9   :  { %v5080_v58 = vld [vmem:[#allocation8 + $0xdc] ss:$12 sps:$4 sm:$0xff]  }
 0x1ba   :  { %4623 = vmatpush3.bf16.msra.mxu1 %v5019_v29  ;;  %v5053_v29 = vld [vmem:[#allocation8 + $0x34] ss:$12 sps:$4 sm:$0xff]  }
 0x1bb   :  { %2862 = vmatprep.subr.bf16.mxu1 %v5086_v6 }
 0x1cd   :  { %v1632_v39 = vpop.f32.mrf.mxu0 }
 0x1ce   :  { %v1633_v60 = vadd.f32 %v1632_v39, %v1592_v59  ;;  %v5094_v39 = vld [vmem:[#allocation8 + $0x1fc] ss:$12 sps:$4 sm:$0xff]   ;;  %v5078_v59 = vld [vmem:[#allocation8 + $0xd8] ss:$12 sps:$4 sm:$0xff]  }
 0x1cf   :  { %v4606_v47 = vpop.f32.mrf.mxu0 }
 0x1d0   :  { %v1641_v0 = vmax.f32 %v1633_v60, 0.0  ;;  %v5092_v47 = vld [vmem:[#allocation8 + $0x1f8] ss:$12 sps:$4 sm:$0xff]  }
 0x1d1   :  { %v1635_v62 = vpop.f32.mrf.mxu0  ;;  %v5083_v60 = vld [vmem:[#allocation8 + $0xc4] ss:$12 sps:$4 sm:$0xff]  }
 0x1d2   :  { %v1636_v44 = vadd.f32 %v1635_v62, %v1595_v61  ;;  %v5098_v61 = vld [vmem:[#allocation8 + $0x1e4] ss:$12 sps:$4 sm:$0xff]   ;;  %v5081_v62 = vld [vmem:[#allocation8 + $0xc0] ss:$12 sps:$4 sm:$0xff]  }
 0x1d3   :  { %v4607_v63 = vpop.f32.mrf.mxu0 }
 0x1d4   :  { %v1644_v1 = vmax.f32 %v1636_v44, 0.0  ;;  %v5096_v44 = vld [vmem:[#allocation8 + $0x1e0] ss:$12 sps:$4 sm:$0xff]  }
 0x1d5   :  { %v5102_v63 = vld [vmem:[#allocation8 + $0x1cc] ss:$12 sps:$4 sm:$0xff]  }
 0x1d6   :  { %v1647_v4 = vpack.c.bf16 %v1644_v1, %v1641_v0  ;;  %v5100_v0 = vld [vmem:[#allocation8 + $0x1c8] ss:$12 sps:$4 sm:$0xff]  }
 0x1d7   :  { %v5106_v1 = vld [vmem:[#allocation8 + $0x1b4] ss:$12 sps:$4 sm:$0xff]  }
 0x1d8   :  { %2221 = vmatmul.mubr.bf16.vlgmr.msra.gmra.mxu0 %v1647_v4  ;;  %4625 = vmatmul.mubr.bf16.vlgmr.msra.gmra.mxu1 %v1647_v4  ;;  %v5110_v4 = vld [vmem:[#allocation8 + $0x19c] ss:$12 sps:$4 sm:$0xff]  }
 0x1d9   :  { %4465 = vmatpush3.bf16.msra.mxu0 %v5021_v2  ;;  %2263 = vmatprep.mubr.bf16.mxu0 %v5568_v20  ;;  %v5038_v20 = vld [vmem:[#allocation8 + $0xac] ss:$12 sps:$4 sm:$0xff]   ;;  %v5104_v2 = vld [vmem:[#allocation8 + $0x1b0] ss:$12 sps:$4 sm:$0xff]  }
 0x1da   :  { %4466 = vmatprep.subr.bf16.mxu0 %v5022_v5  ;;  %2894 = vmatprep.mubr.bf16.mxu1 %v5414_v13  ;;  %v5108_v5 = vld [vmem:[#allocation8 + $0x198] ss:$12 sps:$4 sm:$0xff]  }
 0x1db   :  { %2863 = vmatpush1.bf16.msra.mxu1 %v5084_v54 }
 0x1dc   :  { %2864 = vmatprep.subr.bf16.mxu1 %v5090_v55  ;;  %v5111_v55 = vld [vmem:[#allocation8 + $0x1a0] ss:$12 sps:$4 sm:$0xff]  }
 0x1dd   :  { %4467 = vmatpush3.bf16.msra.mxu0 %v5023_v7  ;;  %v5114_v7 = vld [vmem:[#allocation8 + $0x184] ss:$12 sps:$4 sm:$0xff]  }
 0x1de   :  { %4468 = vmatprep.subr.bf16.mxu0 %v5024_v8  ;;  %v5112_v8 = vld [vmem:[#allocation8 + $0x180] ss:$12 sps:$4 sm:$0xff]  }
 0x1df   :  { %2865 = vmatpush1.bf16.msra.mxu1 %v5088_v57 }
 0x1e0   :  { %2866 = vmatprep.subr.bf16.mxu1 %v5094_v39 }
 0x1e1   :  { %4469 = vmatpush3.bf16.msra.mxu0 %v5025_v9  ;;  %v5116_v9 = vld [vmem:[#allocation8 + $0x170] ss:$12 sps:$4 sm:$0xff]  }
 0x1e2   :  { %4470 = vmatprep.subr.bf16.mxu0 %v5026_v10 }
 0x1e3   :  { %2867 = vmatpush1.bf16.msra.mxu1 %v5092_v47 }
 0x1e4   :  { %2868 = vmatprep.subr.bf16.mxu1 %v5098_v61 }
 0x1e5   :  { %4471 = vmatpush3.bf16.msra.mxu0 %v5027_v11 }
 0x1e6   :  { %4472 = vmatprep.subr.bf16.mxu0 %v5028_v12 }
 0x1e7   :  { %2869 = vmatpush1.bf16.msra.mxu1 %v5096_v44 }
 0x1e8   :  { %2870 = vmatprep.subr.bf16.mxu1 %v5102_v63  ;;  %v5117_v63 = vld [vmem:[#allocation8 + $0xb0] ss:$12 sps:$4 sm:$0xff]  }
 0x1e9   :  { %4473 = vmatpush3.bf16.msra.mxu0 %v5029_v14  ;;  %v1744_v14 = vld [vmem:[%s5658_s4] sm:$0x7] }
 0x1ea   :  { %4474 = vmatprep.subr.bf16.mxu0 %v5030_v15 }
 0x1eb   :  { %2871 = vmatpush1.bf16.msra.mxu1 %v5100_v0 }
 0x1ec   :  { %2872 = vmatprep.subr.bf16.mxu1 %v5106_v1  ;;  %v5118_v1 = vld [vmem:[#allocation8 + $0x158] ss:$12 sps:$4 sm:$0xff]  }
 0x1ed   :  { %4475 = vmatpush3.bf16.msra.mxu0 %v5031_v16  ;;  %v1753_v16 = vrot.slane %v1744_v14, %v5554_v43 }
 0x1ee   :  { %4476 = vmatprep.subr.bf16.mxu0 %v5032_v17  ;;  %v1749_v17 = vrot.slane %v1744_v14, %v5562_v45 }
 0x1ef   :  { %2873 = vmatpush1.bf16.msra.mxu1 %v5104_v2  ;;  %v5119_v2 = vld [vmem:[#allocation8 + $0x98] ss:$12 sps:$4 sm:$0xff]  }
 0x1f0   :  { %2874 = vmatprep.subr.bf16.mxu1 %v5110_v4  ;;  %v5120_v4 = vld [vmem:[#allocation8 + $0x140] ss:$12 sps:$4 sm:$0xff]  }
 0x1f1   :  { %4477 = vmatpush3.bf16.msra.mxu0 %v5033_v40 }
 0x1f2   :  { %4478 = vmatprep.subr.bf16.mxu0 %v5034_v18 }
 0x1f3   :  { %2875 = vmatpush1.bf16.msra.mxu1 %v5108_v5  ;;  %v5121_v5 = vld [vmem:[#allocation8 + $0x80] ss:$12 sps:$4 sm:$0xff]  }
 0x1f4   :  { %2876 = vmatprep.subr.bf16.mxu1 %v5114_v7  ;;  %v5122_v7 = vld [vmem:[#allocation8 + $0x128] ss:$12 sps:$4 sm:$0xff]  }
 0x1f5   :  { %4479 = vmatpush3.bf16.msra.mxu0 %v5035_v19 }
 0x1f6   :  { %2819 = vmatprep.subr.bf16.mxu0 %v5038_v20 }
 0x1f7   :  { %2877 = vmatpush1.bf16.msra.mxu1 %v5112_v8  ;;  %v5123_v8 = vld [vmem:[#allocation8 + $0x68] ss:$12 sps:$4 sm:$0xff]  }
 0x1f8   :  { %2264 = vmatmul.mubr.bf16.vlgmr.msra.gmra.mxu0 %v5570_v22  ;;  %v5056_v22 = vld [vmem:[#allocation8 + $0x1c] ss:$12 sps:$4 sm:$0xff]   ;;  %4495 = vmatprep.subr.bf16.mxu1 %v5116_v9 }
 0x1f9   :  { %2820 = vmatpush1.bf16.msra.mxu0 %v5036_v21  ;;  %v5124_v9 = vld [vmem:[#allocation8 + $0x110] ss:$12 sps:$4 sm:$0xff]  }
 0x1fa   :  { %2821 = vmatprep.subr.bf16.mxu0 %v5041_v23 }
 0x1fd   :  { %2822 = vmatpush1.bf16.msra.mxu0 %v5039_v24 }
 0x1fe   :  { %2823 = vmatprep.subr.bf16.mxu0 %v5044_v25 }
 0x201   :  { %2824 = vmatpush1.bf16.msra.mxu0 %v5042_v26 }
 0x202   :  { %2825 = vmatprep.subr.bf16.mxu0 %v5047_v51 }
 0x205   :  { %2826 = vmatpush1.bf16.msra.mxu0 %v5045_v3 }
 0x206   :  { %2827 = vmatprep.subr.bf16.mxu0 %v5050_v27 }
 0x209   :  { %2828 = vmatpush1.bf16.msra.mxu0 %v5048_v28 }
 0x20a   :  { %2829 = vmatprep.subr.bf16.mxu0 %v5053_v29 }
 0x20d   :  { %2830 = vmatpush1.bf16.msra.mxu0 %v5051_v30 }
 0x20e   :  { %2831 = vmatprep.subr.bf16.mxu0 %v5056_v22 }
 0x211   :  { %2832 = vmatpush1.bf16.msra.mxu0 %v5054_v31 }
 0x212   :  { %2833 = vmatprep.subr.bf16.mxu0 %v5059_v32 }
 0x215   :  { %2834 = vmatpush1.bf16.msra.mxu0 %v5057_v33 }
 0x216   :  { %2835 = vmatprep.subr.bf16.mxu0 %v5062_v34 }
 0x219   :  { %2836 = vmatpush2.bf16.msra.mxu0 %v5060_v36 }
 0x21a   :  { %2837 = vmatprep.subr.bf16.mxu0 %v5065_v37  ;;  %v5087_v37 = vld [vmem:[#allocation8 + $0x230] ss:$12 sps:$4 sm:$0xff]  }
 0x21d   :  { %2838 = vmatpush2.bf16.msra.mxu0 %v5063_v38 }
 0x21e   :  { %2839 = vmatprep.subr.bf16.mxu0 %v5068_v41  ;;  %v5091_v41 = vld [vmem:[#allocation8 + $0x218] ss:$12 sps:$4 sm:$0xff]  }
 0x221   :  { %2840 = vmatpush2.bf16.msra.mxu0 %v5066_v42  ;;  %v5095_v42 = vld [vmem:[#allocation8 + $0x200] ss:$12 sps:$4 sm:$0xff]  }
 0x222   :  { %2841 = vmatprep.subr.bf16.mxu0 %v5071_v48  ;;  %v5099_v48 = vld [vmem:[#allocation8 + $0x1e8] ss:$12 sps:$4 sm:$0xff]  }
 0x225   :  { %2842 = vmatpush2.bf16.msra.mxu0 %v5069_v49  ;;  %v5103_v49 = vld [vmem:[#allocation8 + $0x1d0] ss:$12 sps:$4 sm:$0xff]  }
 0x226   :  { %2843 = vmatprep.subr.bf16.mxu0 %v5074_v50  ;;  %v5107_v50 = vld [vmem:[#allocation8 + $0x1b8] ss:$12 sps:$4 sm:$0xff]  }
 0x229   :  { %2844 = vmatpush2.bf16.msra.mxu0 %v5072_v52 }
 0x22a   :  { %2845 = vmatprep.subr.bf16.mxu0 %v5077_v53  ;;  %v1757_v53 = vrot.slane %v1744_v14, %v5584_v35  ;;  %v5128_v14 = vld [vmem:[#allocation8 + $0xe0] ss:$12 sps:$4 sm:$0xff]  }
 0x22d   :  { %2846 = vmatpush2.bf16.msra.mxu0 %v5075_v56 }
 0x22e   :  { %2847 = vmatprep.subr.bf16.mxu0 %v5080_v58 }
 0x231   :  { %2848 = vmatpush2.bf16.msra.mxu0 %v5078_v59  ;;  %v5115_v59 = vld [vmem:[#allocation8 + $0x188] ss:$12 sps:$4 sm:$0xff]  }
 0x232   :  { %2849 = vmatprep.subr.bf16.mxu0 %v5083_v60 }
 0x235   :  { %2850 = vmatpush2.bf16.msra.mxu0 %v5081_v62 }
 0x236   :  { %4628 = vmatprep.subr.bf16.mxu0 %v5415_v46 }
 0x25d   :  { %v2179_v10 = vpop.f32.mrf.mxu1 }
 0x25e   :  { %v2180_v24 = vadd.f32 %v2179_v10, %v1749_v17  ;;  %v5125_v10 = vld [vmem:[#allocation8 + $0x50] ss:$12 sps:$4 sm:$0xff]  }
 0x25f   :  { %v2181_v11 = vpop.f32.mrf.mxu1 }
 0x260   :  { %v2182_v21 = vadd.f32 %v2181_v11, %v1753_v16  ;;  %v5126_v11 = vld [vmem:[#allocation8 + $0xf8] ss:$12 sps:$4 sm:$0xff]  }
 0x261   :  { %v2183_v12 = vpop.f32.mrf.mxu1 }
 0x262   :  { %v2184_v23 = vadd.f32 %v2183_v12, %v1749_v17  ;;  %v5127_v12 = vld [vmem:[#allocation8 + $0x38] ss:$12 sps:$4 sm:$0xff]  }
 0x263   :  { %v2185_v15 = vpop.f32.mrf.mxu1  ;;  %v5134_v17 = vld [vmem:[#allocation10 + $0xac] ss:$12 sps:$4 sm:$0xff]  }
 0x264   :  { %v2186_v51 = vadd.f32 %v2185_v15, %v1753_v16  ;;  %v5129_v15 = vld [vmem:[#allocation8 + $0x20] ss:$12 sps:$4 sm:$0xff]   ;;  %v5131_v16 = vld [vmem:[#allocation8 + $0x8] ss:$12 sps:$4 sm:$0xff]  }
 0x298   :  { %v2222_v40 = vpop.f32.mrf.mxu0  ;;  %v2306_v18 = vpop.f32.mrf.mxu1 }
 0x299   :  { %v2223_v28 = vadd.f32 %v2222_v40, %v2180_v24  ;;  %v5132_v40 = vld [vmem:[#allocation10 + $0xa8] ss:$12 sps:$4 sm:$0xff]   ;;  %v5141_v24 = vld [vmem:[#allocation10 + $0x60] ss:$12 sps:$4 sm:$0xff]  }
 0x29a   :  { %v2224_v19 = vpop.f32.mrf.mxu0  ;;  %v4626_v20 = vpop.f32.mrf.mxu1 }
 0x29b   :  { %v2225_v3 = vadd.f32 %v2224_v19, %v2182_v21  ;;  %v2313_v34 = vmax.f32 %v2223_v28, 0.0  ;;  %v5135_v19 = vld [vmem:[#allocation10 + $0x90] ss:$12 sps:$4 sm:$0xff]   ;;  %v5138_v21 = vld [vmem:[#allocation10 + $0x78] ss:$12 sps:$4 sm:$0xff]  }
 0x29c   :  { %v2226_v25 = vpop.f32.mrf.mxu0  ;;  %v2309_v26 = vpop.f32.mrf.mxu1  ;;  %v5140_v20 = vld [vmem:[#allocation10 + $0x7c] ss:$12 sps:$4 sm:$0xff]   ;;  %v5150_v28 = vld [vmem:[#allocation10 + $0x18] ss:$12 sps:$4 sm:$0xff]  }
 0x29d   :  { %v2227_v27 = vadd.f32 %v2226_v25, %v2184_v23  ;;  %v2314_v32 = vmax.f32 %v2225_v3, 0.0  ;;  %v5143_v23 = vld [vmem:[#allocation10 + $0x64] ss:$12 sps:$4 sm:$0xff]   ;;  %v5146_v25 = vld [vmem:[#allocation10 + $0x4c] ss:$12 sps:$4 sm:$0xff]  }
 0x29e   :  { %v2228_v29 = vpop.f32.mrf.mxu0  ;;  %v4627_v30 = vpop.f32.mrf.mxu1  ;;  %v5147_v3 = vld [vmem:[#allocation10 + $0x30] ss:$12 sps:$4 sm:$0xff]  }
 0x29f   :  { %v2229_v22 = vadd.f32 %v2228_v29, %v2186_v51  ;;  %v2316_v31 = vmax.f32 %v2227_v27, 0.0  ;;  %v5149_v51 = vld [vmem:[#allocation10 + $0x34] ss:$12 sps:$4 sm:$0xff]   ;;  %v5152_v27 = vld [vmem:[#allocation10 + $0x1c] ss:$12 sps:$4 sm:$0xff]  }
 0x2a0   :  { %v5155_v29 = vld [vmem:[#allocation10 + $0x4] ss:$12 sps:$4 sm:$0xff]   ;;  %v5153_v30 = vld [vmem:[#allocation10] ss:$12 sps:$4 sm:$0xff]  }
 0x2a1   :  { %v2317_v33 = vmax.f32 %v2229_v22, 0.0  ;;  %v5597_v38 = vpack.c.bf16 %v2316_v31, %v2313_v34  ;;  %v5158_v22 = vld [vmem:[#allocation10 + $0x16c] ss:$12 sps:$4 sm:$0xff]   ;;  %v5156_v31 = vld [vmem:[#allocation10 + $0x168] ss:$12 sps:$4 sm:$0xff]  }
 0x2a2   :  { %v5164_v34 = vld [vmem:[#allocation10 + $0x13c] ss:$12 sps:$4 sm:$0xff]  }
 0x2a3   :  { %v2320_v36 = vpack.c.bf16 %v2317_v33, %v2314_v32  ;;  %v5161_v32 = vld [vmem:[#allocation10 + $0x154] ss:$12 sps:$4 sm:$0xff]   ;;  %v5159_v33 = vld [vmem:[#allocation10 + $0x150] ss:$12 sps:$4 sm:$0xff]  }
 0x2a5   :  { %2851 = vmatprep.mubr.bf16.mxu0 %v2320_v36 }
 0x2a6   :  { %2852 = vmatmul.mubr.bf16.vlgmr.msra.gmra.mxu0 %v5597_v38 }
 0x2a7   :  { %4629 = vmatpush3.bf16.msra.mxu0 %v5087_v37  ;;  %4644 = vmatprep.mubr.msk.bf16.mxu0 %vm5416_vm0, %v5415_v46  ;;  %v5167_v37 = vld [vmem:[#allocation10 + $0x124] ss:$12 sps:$4 sm:$0xff]  }
 0x2a8   :  { %4630 = vmatprep.subr.bf16.mxu0 %v5415_v46 }
 0x2ab   :  { %4631 = vmatpush3.bf16.msra.mxu0 %v5091_v41  ;;  %v5170_v41 = vld [vmem:[#allocation10 + $0x10c] ss:$12 sps:$4 sm:$0xff]  }
 0x2ac   :  { %4632 = vmatprep.subr.bf16.mxu0 %v5415_v46 }
 0x2af   :  { %4633 = vmatpush3.bf16.msra.mxu0 %v5095_v42  ;;  %v5168_v42 = vld [vmem:[#allocation10 + $0x108] ss:$12 sps:$4 sm:$0xff]  }
 0x2b0   :  { %4634 = vmatprep.subr.bf16.mxu0 %v5415_v46 }
 0x2b3   :  { %4635 = vmatpush3.bf16.msra.mxu0 %v5099_v48  ;;  %v5173_v48 = vld [vmem:[#allocation10 + $0xf4] ss:$12 sps:$4 sm:$0xff]  }
 0x2b4   :  { %4636 = vmatprep.subr.bf16.mxu0 %v5415_v46 }
 0x2b7   :  { %4637 = vmatpush3.bf16.msra.mxu0 %v5103_v49  ;;  %v5180_v49 = vld [vmem:[#allocation10 + $0x228] ss:$12 sps:$4 sm:$0xff]  }
 0x2b8   :  { %v4480_v52 = vpop.f32.mrf.mxu0  ;;  %4638 = vmatprep.subr.bf16.mxu0 %v5415_v46 }
 0x2ba   :  { %v4481_v54 = vpop.f32.mrf.mxu0 }
 0x2bb   :  { %v4482_v6 = vadd.f32 %v4481_v54, %v4480_v52  ;;  %4639 = vmatpush3.bf16.msra.mxu0 %v5107_v50  ;;  %v5182_v50 = vld [vmem:[#allocation10 + $0x22c] ss:$12 sps:$4 sm:$0xff]   ;;  %v5186_v52 = vld [vmem:[#allocation10 + $0x214] ss:$12 sps:$4 sm:$0xff]   ;;  %v5184_v54 = vld [vmem:[#allocation10 + $0x210] ss:$12 sps:$4 sm:$0xff]  }
 0x2bc   :  { %v4483_v56 = vpop.f32.mrf.mxu0  ;;  %4640 = vmatprep.subr.bf16.mxu0 %v5415_v46 }
 0x2bd   :  { %v2266_v57 = vadd.f32 %v4482_v6, %v1757_v53  ;;  %v5176_v6 = vld [vmem:[#allocation10 + $0xdc] ss:$12 sps:$4 sm:$0xff]  }
 0x2be   :  { %v4484_v58 = vpop.f32.mrf.mxu0 }
 0x2bf   :  { %v4485_v39 = vadd.f32 %v4484_v58, %v4483_v56  ;;  %4641 = vmatpush3.bf16.msra.mxu0 %v5111_v55  ;;  %v2307_v47 = vadd.f32 %v2306_v18, %v2266_v57  ;;  %v5137_v18 = vld [vmem:[#allocation10 + $0x94] ss:$12 sps:$4 sm:$0xff]   ;;  %v5190_v55 = vld [vmem:[#allocation10 + $0x1fc] ss:$12 sps:$4 sm:$0xff]   ;;  %v5174_v56 = vld [vmem:[#allocation10 + $0xd8] ss:$12 sps:$4 sm:$0xff]  }
 0x2c0   :  { %4642 = vmatprep.subr.bf16.mxu0 %v5415_v46  ;;  %v5188_v57 = vld [vmem:[#allocation10 + $0x1f8] ss:$12 sps:$4 sm:$0xff]  }
 0x2c1   :  { %v2269_v60 = vadd.f32 %v4485_v39, %v1757_v53  ;;  %v2315_v62 = vmax.f32 %v2307_v47, 0.0  ;;  %v5171_v53 = vld [vmem:[#allocation10 + $0xf0] ss:$12 sps:$4 sm:$0xff]   ;;  %v5192_v47 = vld [vmem:[#allocation10 + $0x1e0] ss:$12 sps:$4 sm:$0xff]  }
 0x2c2   :  { %v5179_v58 = vld [vmem:[#allocation10 + $0xc4] ss:$12 sps:$4 sm:$0xff]  }
 0x2c3   :  { %v2310_v61 = vadd.f32 %v2309_v26, %v2269_v60  ;;  %4643 = vmatpush3.bf16.msra.mxu0 %v5115_v59  ;;  %v5144_v26 = vld [vmem:[#allocation10 + $0x48] ss:$12 sps:$4 sm:$0xff]   ;;  %v5194_v39 = vld [vmem:[#allocation10 + $0x1e4] ss:$12 sps:$4 sm:$0xff]   ;;  %v5177_v59 = vld [vmem:[#allocation10 + $0xc0] ss:$12 sps:$4 sm:$0xff]  }
 0x2c4   :  { %3536 = vmatprep.subr.bf16.mxu0 %v5182_v50  ;;  %v5198_v60 = vld [vmem:[#allocation10 + $0x1cc] ss:$12 sps:$4 sm:$0xff]  }
 0x2c5   :  { %v2318_v44 = vmax.f32 %v2310_v61, 0.0  ;;  %v5196_v61 = vld [vmem:[#allocation10 + $0x1c8] ss:$12 sps:$4 sm:$0xff]   ;;  %v5207_v50 = vld [vmem:[#allocation10 + $0x1a0] ss:$12 sps:$4 sm:$0xff]  }
 0x2c7   :  { %v2321_v0 = vpack.c.bf16 %v2318_v44, %v2315_v62  ;;  %v5202_v62 = vld [vmem:[#allocation10 + $0x1b4] ss:$12 sps:$4 sm:$0xff]   ;;  %v5200_v44 = vld [vmem:[#allocation10 + $0x1b0] ss:$12 sps:$4 sm:$0xff]  }
 0x2c9   :  { %2895 = vmatmul.mubr.bf16.vlgmr.msra.gmra.mxu1 %v2321_v0  ;;  %4645 = vmatmul.mubr.bf16.vlgmr.msra.gmra.mxu0 %v2321_v0  ;;  %v5204_v0 = vld [vmem:[#allocation10 + $0x198] ss:$12 sps:$4 sm:$0xff]  }
 0x2ca   :  { %4496 = vmatpush3.bf16.msra.mxu1 %v5117_v63  ;;  %2937 = vmatprep.mubr.bf16.mxu1 %v2320_v36  ;;  %v5162_v36 = vld [vmem:[#allocation10 + $0x138] ss:$12 sps:$4 sm:$0xff]   ;;  %v5206_v63 = vld [vmem:[#allocation10 + $0x19c] ss:$12 sps:$4 sm:$0xff]  }
 0x2cb   :  { %4497 = vmatprep.subr.bf16.mxu1 %v5118_v1  ;;  %3568 = vmatprep.mubr.bf16.mxu0 %v5414_v13  ;;  %v5130_v13 = vld [vmem:[#allocation8 + $0xc8] ss:$12 sps:$4 sm:$0xff]   ;;  %v5210_v1 = vld [vmem:[#allocation10 + $0x184] ss:$12 sps:$4 sm:$0xff]  }
 0x2cc   :  { %3537 = vmatpush1.bf16.msra.mxu0 %v5180_v49 }
 0x2cd   :  { %3538 = vmatprep.subr.bf16.mxu0 %v5186_v52 }
 0x2ce   :  { %4498 = vmatpush3.bf16.msra.mxu1 %v5119_v2  ;;  %v5208_v2 = vld [vmem:[#allocation10 + $0x180] ss:$12 sps:$4 sm:$0xff]  }
 0x2cf   :  { %4499 = vmatprep.subr.bf16.mxu1 %v5120_v4  ;;  %v5212_v4 = vld [vmem:[#allocation10 + $0x170] ss:$12 sps:$4 sm:$0xff]  }
 0x2d0   :  { %3539 = vmatpush1.bf16.msra.mxu0 %v5184_v54 }
 0x2d1   :  { %3540 = vmatprep.subr.bf16.mxu0 %v5190_v55  ;;  %v5211_v55 = vld [vmem:[#allocation10 + $0x188] ss:$12 sps:$4 sm:$0xff]  }
 0x2d2   :  { %4500 = vmatpush3.bf16.msra.mxu1 %v5121_v5 }
 0x2d3   :  { %4501 = vmatprep.subr.bf16.mxu1 %v5122_v7 }
 0x2d4   :  { %3541 = vmatpush1.bf16.msra.mxu0 %v5188_v57 }
 0x2d5   :  { %3542 = vmatprep.subr.bf16.mxu0 %v5194_v39 }
 0x2d6   :  { %4502 = vmatpush3.bf16.msra.mxu1 %v5123_v8 }
 0x2d7   :  { %4503 = vmatprep.subr.bf16.mxu1 %v5124_v9  ;;  %v2418_v9 = vld [vmem:[%s5660_s6] sm:$0x7] }
 0x2d8   :  { %3543 = vmatpush1.bf16.msra.mxu0 %v5192_v47  ;;  %v5213_v47 = vld [vmem:[#allocation10 + $0xb0] ss:$12 sps:$4 sm:$0xff]  }
 0x2d9   :  { %3544 = vmatprep.subr.bf16.mxu0 %v5198_v60 }
 0x2da   :  { %4504 = vmatpush3.bf16.msra.mxu1 %v5125_v10 }
 0x2db   :  { %4505 = vmatprep.subr.bf16.mxu1 %v5126_v11  ;;  %v2427_v11 = vrot.slane %v2418_v9, %v5554_v43 }
 0x2dc   :  { %3545 = vmatpush1.bf16.msra.mxu0 %v5196_v61  ;;  %v5214_v61 = vld [vmem:[#allocation10 + $0x158] ss:$12 sps:$4 sm:$0xff]  }
 0x2dd   :  { %3546 = vmatprep.subr.bf16.mxu0 %v5202_v62  ;;  %v5215_v62 = vld [vmem:[#allocation10 + $0x98] ss:$12 sps:$4 sm:$0xff]  }
 0x2de   :  { %4506 = vmatpush3.bf16.msra.mxu1 %v5127_v12  ;;  %v2423_v12 = vrot.slane %v2418_v9, %v5562_v45 }
 0x2df   :  { %4507 = vmatprep.subr.bf16.mxu1 %v5128_v14 }
 0x2e0   :  { %3547 = vmatpush1.bf16.msra.mxu0 %v5200_v44  ;;  %v5216_v44 = vld [vmem:[#allocation10 + $0x140] ss:$12 sps:$4 sm:$0xff]  }
 0x2e1   :  { %3548 = vmatprep.subr.bf16.mxu0 %v5206_v63  ;;  %v5217_v63 = vld [vmem:[#allocation10 + $0x80] ss:$12 sps:$4 sm:$0xff]  }
 0x2e2   :  { %4508 = vmatpush3.bf16.msra.mxu1 %v5129_v15 }
 0x2e3   :  { %4509 = vmatprep.subr.bf16.mxu1 %v5130_v13 }
 0x2e4   :  { %3549 = vmatpush1.bf16.msra.mxu0 %v5204_v0  ;;  %v5218_v0 = vld [vmem:[#allocation10 + $0x128] ss:$12 sps:$4 sm:$0xff]  }
 0x2e5   :  { %3550 = vmatprep.subr.bf16.mxu0 %v5210_v1  ;;  %v5219_v1 = vld [vmem:[#allocation10 + $0x68] ss:$12 sps:$4 sm:$0xff]  }
 0x2e6   :  { %4510 = vmatpush3.bf16.msra.mxu1 %v5131_v16 }
 0x2e7   :  { %3493 = vmatprep.subr.bf16.mxu1 %v5134_v17 }
 0x2e8   :  { %3551 = vmatpush1.bf16.msra.mxu0 %v5208_v2  ;;  %v5220_v2 = vld [vmem:[#allocation10 + $0x110] ss:$12 sps:$4 sm:$0xff]  }
 0x2e9   :  { %2938 = vmatmul.mubr.bf16.vlgmr.msra.gmra.mxu1 %v5597_v38  ;;  %v5165_v38 = vld [vmem:[#allocation10 + $0x120] ss:$12 sps:$4 sm:$0xff]   ;;  %4526 = vmatprep.subr.bf16.mxu0 %v5212_v4  ;;  %v5221_v4 = vld [vmem:[#allocation10 + $0x50] ss:$12 sps:$4 sm:$0xff]  }
 0x2ea   :  { %3494 = vmatpush1.bf16.msra.mxu1 %v5132_v40 }
 0x2eb   :  { %3495 = vmatprep.subr.bf16.mxu1 %v5137_v18 }
 0x2ee   :  { %3496 = vmatpush1.bf16.msra.mxu1 %v5135_v19 }
 0x2ef   :  { %3497 = vmatprep.subr.bf16.mxu1 %v5140_v20 }
 0x2f2   :  { %3498 = vmatpush1.bf16.msra.mxu1 %v5138_v21 }
 0x2f3   :  { %3499 = vmatprep.subr.bf16.mxu1 %v5143_v23 }
 0x2f6   :  { %3500 = vmatpush1.bf16.msra.mxu1 %v5141_v24 }
 0x2f7   :  { %3501 = vmatprep.subr.bf16.mxu1 %v5146_v25 }
 0x2fa   :  { %3502 = vmatpush1.bf16.msra.mxu1 %v5144_v26 }
 0x2fb   :  { %3503 = vmatprep.subr.bf16.mxu1 %v5149_v51 }
 0x2fe   :  { %3504 = vmatpush1.bf16.msra.mxu1 %v5147_v3 }
 0x2ff   :  { %3505 = vmatprep.subr.bf16.mxu1 %v5152_v27 }
 0x302   :  { %3506 = vmatpush1.bf16.msra.mxu1 %v5150_v28 }
 0x303   :  { %3507 = vmatprep.subr.bf16.mxu1 %v5155_v29 }
 0x306   :  { %3508 = vmatpush1.bf16.msra.mxu1 %v5153_v30 }
 0x307   :  { %3509 = vmatprep.subr.bf16.mxu1 %v5158_v22 }
 0x30a   :  { %3510 = vmatpush2.bf16.msra.mxu1 %v5156_v31  ;;  %v5183_v31 = vld [vmem:[#allocation10 + $0x230] ss:$12 sps:$4 sm:$0xff]  }
 0x30b   :  { %3511 = vmatprep.subr.bf16.mxu1 %v5161_v32 }
 0x30e   :  { %3512 = vmatpush2.bf16.msra.mxu1 %v5159_v33  ;;  %v5187_v33 = vld [vmem:[#allocation10 + $0x218] ss:$12 sps:$4 sm:$0xff]  }
 0x30f   :  { %3513 = vmatprep.subr.bf16.mxu1 %v5164_v34  ;;  %v5191_v34 = vld [vmem:[#allocation10 + $0x200] ss:$12 sps:$4 sm:$0xff]  }
 0x312   :  { %3514 = vmatpush2.bf16.msra.mxu1 %v5162_v36  ;;  %v5195_v36 = vld [vmem:[#allocation10 + $0x1e8] ss:$12 sps:$4 sm:$0xff]  }
 0x313   :  { %3515 = vmatprep.subr.bf16.mxu1 %v5167_v37  ;;  %v5199_v37 = vld [vmem:[#allocation10 + $0x1d0] ss:$12 sps:$4 sm:$0xff]  }
 0x316   :  { %3516 = vmatpush2.bf16.msra.mxu1 %v5165_v38  ;;  %v5203_v38 = vld [vmem:[#allocation10 + $0x1b8] ss:$12 sps:$4 sm:$0xff]  }
 0x317   :  { %3517 = vmatprep.subr.bf16.mxu1 %v5170_v41 }
 0x31a   :  { %3518 = vmatpush2.bf16.msra.mxu1 %v5168_v42  ;;  %v2431_v42 = vrot.slane %v2418_v9, %v5584_v35  ;;  %v5225_v9 = vld [vmem:[#allocation10 + $0x20] ss:$12 sps:$4 sm:$0xff]  }
 0x31b   :  { %3519 = vmatprep.subr.bf16.mxu1 %v5173_v48 }
 0x31e   :  { %3520 = vmatpush2.bf16.msra.mxu1 %v5171_v53 }
 0x31f   :  { %3521 = vmatprep.subr.bf16.mxu1 %v5176_v6 }
 0x322   :  { %3522 = vmatpush2.bf16.msra.mxu1 %v5174_v56 }
 0x323   :  { %3523 = vmatprep.subr.bf16.mxu1 %v5179_v58 }
 0x326   :  { %3524 = vmatpush2.bf16.msra.mxu1 %v5177_v59 }
 0x327   :  { %4648 = vmatprep.subr.bf16.mxu1 %v5415_v46 }
 0x366   :  { %v2853_v5 = vpop.f32.mrf.mxu0 }
 0x367   :  { %v2854_v18 = vadd.f32 %v2853_v5, %v2423_v12  ;;  %v5222_v5 = vld [vmem:[#allocation10 + $0xf8] ss:$12 sps:$4 sm:$0xff]  }
 0x368   :  { %v2855_v7 = vpop.f32.mrf.mxu0 }
 0x369   :  { %v2856_v17 = vadd.f32 %v2855_v7, %v2427_v11  ;;  %v5223_v7 = vld [vmem:[#allocation10 + $0x38] ss:$12 sps:$4 sm:$0xff]  }
 0x36a   :  { %v2857_v8 = vpop.f32.mrf.mxu0 }
 0x36b   :  { %v2858_v40 = vadd.f32 %v2857_v8, %v2423_v12  ;;  %v5224_v8 = vld [vmem:[#allocation10 + $0xe0] ss:$12 sps:$4 sm:$0xff]   ;;  %v5228_v12 = vld [vmem:[#allocation11 + $0x78] sm:$0xff]  }
 0x36c   :  { %v2859_v10 = vpop.f32.mrf.mxu0 }
 0x36d   :  { %v2860_v21 = vadd.f32 %v2859_v10, %v2427_v11  ;;  %v5226_v10 = vld [vmem:[#allocation10 + $0xc8] ss:$12 sps:$4 sm:$0xff]  }
 0x36e   :  { %v5227_v11 = vld [vmem:[#allocation10 + $0x8] ss:$12 sps:$4 sm:$0xff]  }
 0x389   :  { %v2896_v14 = vpop.f32.mrf.mxu1  ;;  %v2980_v15 = vpop.f32.mrf.mxu0 }
 0x38a   :  { %v2897_v25 = vadd.f32 %v2896_v14, %v2854_v18  ;;  %v5229_v14 = vld [vmem:[#allocation11 + $0x38] sm:$0xff]   ;;  %v5235_v18 = vld [vmem:[#allocation11 + $0x20] sm:$0xff]  }
 0x38b   :  { %v2898_v13 = vpop.f32.mrf.mxu1  ;;  %v4646_v16 = vpop.f32.mrf.mxu0 }
 0x38c   :  { %v2899_v23 = vadd.f32 %v2898_v13, %v2856_v17  ;;  %v2987_v30 = vmax.f32 %v2897_v25, 0.0  ;;  %v5231_v13 = vld [vmem:[#allocation11 + $0x30] sm:$0xff]   ;;  %v5232_v16 = vld [vmem:[#allocation11 + $0x68] sm:$0xff]  }
 0x38d   :  { %v2900_v19 = vpop.f32.mrf.mxu1  ;;  %v2983_v20 = vpop.f32.mrf.mxu0  ;;  %v5233_v17 = vld [vmem:[#allocation11 + $0x28] sm:$0xff]  }
 0x38e   :  { %v2901_v24 = vadd.f32 %v2900_v19, %v2858_v40  ;;  %v2988_v28 = vmax.f32 %v2899_v23, 0.0  ;;  %v5234_v40 = vld [vmem:[#allocation11 + $0x60] sm:$0xff]   ;;  %v5236_v19 = vld [vmem:[#allocation11 + $0x58] sm:$0xff]   ;;  %v5239_v23 = vld [vmem:[#allocation11 + $0x10] sm:$0xff]  }
 0x38f   :  { %v2902_v26 = vpop.f32.mrf.mxu1  ;;  %v4647_v51 = vpop.f32.mrf.mxu0  ;;  %v5241_v25 = vld [vmem:[#allocation11 + $0x8] sm:$0xff]  }
 0x390   :  { %v2903_v3 = vadd.f32 %v2902_v26, %v2860_v21  ;;  %v2990_v27 = vmax.f32 %v2901_v24, 0.0  ;;  %v5238_v21 = vld [vmem:[#allocation11 + $0x50] sm:$0xff]   ;;  %v5240_v24 = vld [vmem:[#allocation11 + $0x48] sm:$0xff]   ;;  %v5242_v26 = vld [vmem:[#allocation11 + $0x40] sm:$0xff]  }
 0x391   :  { %v5243_v51 = vld [vmem:[#allocation11] sm:$0xff]  }
 0x392   :  { %v2991_v29 = vmax.f32 %v2903_v3, 0.0  ;;  %v5618_v32 = vpack.c.bf16 %v2990_v27, %v2987_v30  ;;  %v5244_v3 = vld [vmem:[#allocation11 + $0xb8] sm:$0xff]   ;;  %v5245_v27 = vld [vmem:[#allocation11 + $0xb0] sm:$0xff]  }
 0x393   :  { %v5248_v30 = vld [vmem:[#allocation11 + $0x98] sm:$0xff]  }
 0x394   :  { %v2994_v22 = vpack.c.bf16 %v2991_v29, %v2988_v28  ;;  %v5246_v28 = vld [vmem:[#allocation11 + $0xa8] sm:$0xff]   ;;  %v5247_v29 = vld [vmem:[#allocation11 + $0xa0] sm:$0xff]  }
 0x396   :  { %3525 = vmatprep.mubr.bf16.mxu1 %v2994_v22 }
 0x397   :  { %3526 = vmatmul.mubr.bf16.vlgmr.msra.gmra.mxu1 %v5618_v32 }
 0x398   :  { %4649 = vmatpush3.bf16.msra.mxu1 %v5183_v31  ;;  %4664 = vmatprep.mubr.msk.bf16.mxu1 %vm5416_vm0, %v5415_v46  ;;  %v5250_v31 = vld [vmem:[#allocation11 + $0x88] sm:$0xff]  }
 0x399   :  { %4650 = vmatprep.subr.bf16.mxu1 %v5415_v46 }
 0x39c   :  { %4651 = vmatpush3.bf16.msra.mxu1 %v5187_v33 }
 0x39d   :  { %4652 = vmatprep.subr.bf16.mxu1 %v5415_v46 }
 0x3a0   :  { %4653 = vmatpush3.bf16.msra.mxu1 %v5191_v34 }
 0x3a1   :  { %4654 = vmatprep.subr.bf16.mxu1 %v5415_v46 }
 0x3a4   :  { %4655 = vmatpush3.bf16.msra.mxu1 %v5195_v36 }
 0x3a5   :  { %4656 = vmatprep.subr.bf16.mxu1 %v5415_v46 }
 0x3a8   :  { %4657 = vmatpush3.bf16.msra.mxu1 %v5199_v37  ;;  %v3092_v37 = vld [vmem:[%s5662_s8] sm:$0x7] }
 0x3a9   :  { %v4511_v41 = vpop.f32.mrf.mxu1  ;;  %4658 = vmatprep.subr.bf16.mxu1 %v5415_v46 }
 0x3ab   :  { %v4512_v48 = vpop.f32.mrf.mxu1 }
 0x3ac   :  { %v4513_v49 = vadd.f32 %v4512_v48, %v4511_v41  ;;  %4659 = vmatpush3.bf16.msra.mxu1 %v5203_v38  ;;  %v3101_v41 = vrot.slane %v3092_v37, %v5554_v43 }
 0x3ad   :  { %v4514_v52 = vpop.f32.mrf.mxu1  ;;  %4660 = vmatprep.subr.bf16.mxu1 %v5415_v46 }
 0x3ae   :  { %v2940_v53 = vadd.f32 %v4513_v49, %v2431_v42 }
 0x3af   :  { %v4515_v54 = vpop.f32.mrf.mxu1 }
 0x3b0   :  { %v4516_v6 = vadd.f32 %v4515_v54, %v4514_v52  ;;  %4661 = vmatpush3.bf16.msra.mxu1 %v5207_v50  ;;  %v2981_v56 = vadd.f32 %v2980_v15, %v2940_v53  ;;  %v5230_v15 = vld [vmem:[#allocation11 + $0x70] sm:$0xff]  }
 0x3b1   :  { %4662 = vmatprep.subr.bf16.mxu1 %v5415_v46 }
 0x3b2   :  { %v2943_v57 = vadd.f32 %v4516_v6, %v2431_v42  ;;  %v2989_v39 = vmax.f32 %v2981_v56, 0.0  ;;  %v3097_v42 = vrot.slane %v3092_v37, %v5562_v45 }
 0x3b4   :  { %v2984_v58 = vadd.f32 %v2983_v20, %v2943_v57  ;;  %4663 = vmatpush3.bf16.msra.mxu1 %v5211_v55  ;;  %v5237_v20 = vld [vmem:[#allocation11 + $0x18] sm:$0xff]  }
 0x3b5   :  { %4668 = vmatprep.subr.bf16.mxu1 %v5415_v46 }
 0x3b6   :  { %v2992_v59 = vmax.f32 %v2984_v58, 0.0 }
 0x3b8   :  { %v2995_v60 = vpack.c.bf16 %v2992_v59, %v2989_v39 }
 0x3ba   :  { %3569 = vmatmul.mubr.bf16.vlgmr.msra.gmra.mxu0 %v2995_v60  ;;  %4665 = vmatmul.mubr.bf16.vlgmr.msra.gmra.mxu1 %v2995_v60 }
 0x3bb   :  { %4527 = vmatpush3.bf16.msra.mxu0 %v5213_v47  ;;  %3611 = vmatprep.mubr.bf16.mxu0 %v2994_v22  ;;  %v5249_v22 = vld [vmem:[#allocation11 + $0x90] sm:$0xff]  }
 0x3bc   :  { %4528 = vmatprep.subr.bf16.mxu0 %v5214_v61  ;;  %4684 = vmatprep.mubr.msk.bf16.mxu1 %vm5416_vm0, %v5415_v46 }
 0x3bd   :  { %4669 = vmatpush3.bf16.msra.mxu1 %v5244_v3 }
 0x3be   :  { %4670 = vmatprep.subr.bf16.mxu1 %v5415_v46 }
 0x3bf   :  { %4529 = vmatpush3.bf16.msra.mxu0 %v5215_v62 }
 0x3c0   :  { %4530 = vmatprep.subr.bf16.mxu0 %v5216_v44 }
 0x3c1   :  { %4671 = vmatpush3.bf16.msra.mxu1 %v5245_v27 }
 0x3c2   :  { %4672 = vmatprep.subr.bf16.mxu1 %v5415_v46 }
 0x3c3   :  { %4531 = vmatpush3.bf16.msra.mxu0 %v5217_v63 }
 0x3c4   :  { %4532 = vmatprep.subr.bf16.mxu0 %v5218_v0 }
 0x3c5   :  { %4673 = vmatpush3.bf16.msra.mxu1 %v5246_v28 }
 0x3c6   :  { %4674 = vmatprep.subr.bf16.mxu1 %v5415_v46 }
 0x3c7   :  { %4533 = vmatpush3.bf16.msra.mxu0 %v5219_v1  ;;  %v3105_v1 = vrot.slane %v3092_v37, %v5584_v35  ;;  %v4364_v35 = vld [vmem:[%s5664_s10] ss:$0 sm:$0xff] }
 0x3c8   :  { %4534 = vmatprep.subr.bf16.mxu0 %v5220_v2 }
 0x3c9   :  { %4675 = vmatpush3.bf16.msra.mxu1 %v5247_v29 }
 0x3ca   :  { %4676 = vmatprep.subr.bf16.mxu1 %v5415_v46 }
 0x3cb   :  { %4535 = vmatpush3.bf16.msra.mxu0 %v5221_v4 }
 0x3cc   :  { %4536 = vmatprep.subr.bf16.mxu0 %v5222_v5 }
 0x3cd   :  { %4677 = vmatpush3.bf16.msra.mxu1 %v5248_v30 }
 0x3ce   :  { %4678 = vmatprep.subr.bf16.mxu1 %v5415_v46 }
 0x3cf   :  { %4537 = vmatpush3.bf16.msra.mxu0 %v5223_v7 }
 0x3d0   :  { %4538 = vmatprep.subr.bf16.mxu0 %v5224_v8 }
 0x3d1   :  { %4679 = vmatpush3.bf16.msra.mxu1 %v5249_v22 }
 0x3d2   :  { %4680 = vmatprep.subr.bf16.mxu1 %v5415_v46 }
 0x3d3   :  { %4539 = vmatpush3.bf16.msra.mxu0 %v5225_v9 }
 0x3d4   :  { %4540 = vmatprep.subr.bf16.mxu0 %v5226_v10 }
 0x3d5   :  { %4681 = vmatpush3.bf16.msra.mxu1 %v5250_v31 }
 0x3d6   :  { %4682 = vmatprep.subr.bf16.mxu1 %v5415_v46 }
 0x3d7   :  { %4541 = vmatpush3.bf16.msra.mxu0 %v5227_v11 }
 0x3d8   :  { %4557 = vmatprep.subr.bf16.mxu0 %v5228_v12 }
 0x3da   :  { %3612 = vmatmul.mubr.bf16.vlgmr.msra.gmra.mxu0 %v5618_v32  ;;  %v5251_v32 = vld [vmem:[#allocation11 + $0x80] sm:$0xff]  }
 0x3db   :  { %4558 = vmatpush3.bf16.msra.mxu0 %v5229_v14  ;;  %4683 = vmatpush3.bf16.msra.mxu1 %v5251_v32 }
 0x3dc   :  { %4559 = vmatprep.subr.bf16.mxu0 %v5230_v15 }
 0x3df   :  { %4560 = vmatpush3.bf16.msra.mxu0 %v5231_v13 }
 0x3e0   :  { %4561 = vmatprep.subr.bf16.mxu0 %v5232_v16 }
 0x3e3   :  { %4562 = vmatpush3.bf16.msra.mxu0 %v5233_v17 }
 0x3e4   :  { %4563 = vmatprep.subr.bf16.mxu0 %v5234_v40 }
 0x3e7   :  { %4564 = vmatpush3.bf16.msra.mxu0 %v5235_v18 }
 0x3e8   :  { %4565 = vmatprep.subr.bf16.mxu0 %v5236_v19 }
 0x3eb   :  { %4566 = vmatpush3.bf16.msra.mxu0 %v5237_v20 }
 0x3ec   :  { %4567 = vmatprep.subr.bf16.mxu0 %v5238_v21 }
 0x3ef   :  { %4568 = vmatpush3.bf16.msra.mxu0 %v5239_v23 }
 0x3f0   :  { %4569 = vmatprep.subr.bf16.mxu0 %v5240_v24 }
 0x3f3   :  { %4570 = vmatpush3.bf16.msra.mxu0 %v5241_v25 }
 0x3f4   :  { %4571 = vmatprep.subr.bf16.mxu0 %v5242_v26 }
 0x3f7   :  { %4572 = vmatpush3.bf16.msra.mxu0 %v5243_v51 }
 0x457   :  { %v3527_v33 = vpop.f32.mrf.mxu1 }
 0x458   :  { %v3528_v54 = vadd.f32 %v3527_v33, %v3097_v42 }
 0x459   :  { %v3529_v34 = vpop.f32.mrf.mxu1 }
 0x45a   :  { %v3530_v53 = vadd.f32 %v3529_v34, %v3101_v41 }
 0x45b   :  { %v3531_v36 = vpop.f32.mrf.mxu1 }
 0x45c   :  { %v3532_v46 = vadd.f32 %v3531_v36, %v3097_v42 }
 0x45d   :  { %v3533_v38 = vpop.f32.mrf.mxu1 }
 0x45e   :  { %v3534_v56 = vadd.f32 %v3533_v38, %v3101_v41 }
 0x47a   :  { %v3570_v48 = vpop.f32.mrf.mxu0  ;;  %v3654_v49 = vpop.f32.mrf.mxu1 }
 0x47b   :  { %v3571_v39 = vadd.f32 %v3570_v48, %v3528_v54 }
 0x47c   :  { %v3572_v50 = vpop.f32.mrf.mxu0  ;;  %v4666_v52 = vpop.f32.mrf.mxu1 }
 0x47d   :  { %v3573_v57 = vadd.f32 %v3572_v50, %v3530_v53  ;;  %v3661_v45 = vmax.f32 %v3571_v39, 0.0 }
 0x47e   :  { %v3574_v6 = vpop.f32.mrf.mxu0  ;;  %v3657_v55 = vpop.f32.mrf.mxu1 }
 0x47f   :  { %v3575_v58 = vadd.f32 %v3574_v6, %v3532_v46  ;;  %v3662_v43 = vmax.f32 %v3573_v57, 0.0 }
 0x480   :  { %v3576_v59 = vpop.f32.mrf.mxu0  ;;  %v4667_v47 = vpop.f32.mrf.mxu1 }
 0x481   :  { %v3577_v60 = vadd.f32 %v3576_v59, %v3534_v56  ;;  %v3664_v61 = vmax.f32 %v3575_v58, 0.0 }
 0x483   :  { %v3665_v62 = vmax.f32 %v3577_v60, 0.0  ;;  %v3667_v63 = vpack.c.bf16 %v3664_v61, %v3661_v45 }
 0x485   :  { %v3668_v44 = vpack.c.bf16 %v3665_v62, %v3662_v43 }
 0x487   :  { %3901 = vmatprep.mubr.bf16.mxu0 %v3668_v44 }
 0x488   :  { %3902 = vmatmul.mubr.bf16.vlgmr.msra.gmra.mxu0 %v3667_v63 }
 0x49a   :  { %v4542_v0 = vpop.f32.mrf.mxu0 }
 0x49c   :  { %v4543_v2 = vpop.f32.mrf.mxu0 }
 0x49d   :  { %v4544_v4 = vadd.f32 %v4543_v2, %v4542_v0 }
 0x49e   :  { %v4545_v5 = vpop.f32.mrf.mxu0 }
 0x49f   :  { %v3614_v7 = vadd.f32 %v4544_v4, %v3105_v1 }
 0x4a0   :  { %v4546_v8 = vpop.f32.mrf.mxu0 }
 0x4a1   :  { %v4547_v9 = vadd.f32 %v4546_v8, %v4545_v5  ;;  %v3655_v10 = vadd.f32 %v3654_v49, %v3614_v7 }
 0x4a3   :  { %v3617_v11 = vadd.f32 %v4547_v9, %v3105_v1  ;;  %v3663_v14 = vmax.f32 %v3655_v10, 0.0 }
 0x4a5   :  { %v3658_v12 = vadd.f32 %v3657_v55, %v3617_v11 }
 0x4a7   :  { %v3666_v15 = vmax.f32 %v3658_v12, 0.0 }
 0x4a9   :  { %v3669_v13 = vpack.c.bf16 %v3666_v15, %v3663_v14 }
 0x4ab   :  { %4685 = vmatmul.mubr.bf16.vlgmr.msra.gmra.mxu1 %v3669_v13 }
 0x548   :  { %v4573_v16 = vpop.f32.mrf.mxu0 }
 0x54a   :  { %v4574_v17 = vpop.f32.mrf.mxu0 }
 0x54b   :  { %v4575_v18 = vadd.f32 %v4574_v17, %v4573_v16 }
 0x54c   :  { %v4576_v40 = vpop.f32.mrf.mxu0 }
 0x54d   :  { %v3904_v21 = vadd.f32 %v4575_v18, %v4364_v35 }
 0x54e   :  { %v4577_v19 = vpop.f32.mrf.mxu0 }
 0x54f   :  { %v4578_v20 = vadd.f32 %v4577_v19, %v4576_v40 }
 0x551   :  { %v3907_v26 = vadd.f32 %v4578_v20, %v4364_v35 }
 0x56b   :  { %v3944_v23 = vpop.f32.mrf.mxu1 }
 0x56c   :  { %v3945_v24 = vadd.f32 %v3944_v23, %v3904_v21 }
 0x56d   :  { %v4686_v25 = vpop.f32.mrf.mxu1 }
 0x56e   :  { %3951 = vst [vmem:[#allocation13] sm:$0xff] %v3945_v24 }
 0x56f   :  { %v3947_v51 = vpop.f32.mrf.mxu1 }
 0x570   :  { %v3948_v3 = vadd.f32 %v3947_v51, %v3907_v26 }
 0x571   :  { %v4687_v27 = vpop.f32.mrf.mxu1 }
 0x572   :  { %3952 = vst [vmem:[#allocation13 + $0x8] sm:$0xff] %v3948_v3 }
 0x573   :  { %5383 = shalt.err (!%p5380_p6)
}
 0x574   :  { %s5418_s10 = smov 128   ;;  %s5419_s17 = smov 8  }
 0x575   :  { %3964 = dma.vmem_to_hbm [thread:$0]  %s3959_s15, 256, %s5665_s11, [#allocation4], %s5418_s10, %s5418_s10, %s5419_s17  }
 0x576   :  { %5400 = dma.done.wait [#allocation4], 256  }
 0x577   :  { %5401 = vsyncadd [#allocation4], 4294967040 }
 0x578   :  { %3968 = vsyncpa [#allocation3], 1 }
 0x579   :  { %3969 = vsyncpa [#allocation6], 1 }
 0x57a   :  { %3970 = vsyncpa [#allocation9], 1 }
 0x57b   :  { %3971 = vsyncpa [#allocation12], 1 }
 0x57c   :  { %3972 = vsyncpa [#allocation4], 1 }

</bundles_post_ra>
